<compile_context>
chip_gen: v7x
topology: tpu7x:2x2x1
jax: 0.10.0
libtpu: 0.0.40
codegen_flags: <defaults>
</compile_context>

<pallas_src>
import functools
import math

import jax
import jax.numpy as jnp
from jax import lax
from jax.experimental import pallas as pl
from jax.experimental.pallas import tpu as pltpu


# --------------------------------------------------------------------------
# Hardware / capability probes
# --------------------------------------------------------------------------
def _vmem_capacity_bytes() -> int:
    """Per-core VMEM capacity.  Falls back to the v7x per-TC size (the smallest
    across v5e/v6e/v7x), so derived budgets are safe on every generation."""
    try:
        return int(pltpu.get_tpu_info().vmem_capacity_bytes)
    except Exception:
        return 64 * 1024 * 1024


@functools.lru_cache(maxsize=None)
def _single_buffer_supported() -> bool:
    """True iff this JAX build accepts pl.Buffered(1) as a BlockSpec pipeline mode.

    Single-buffering the grid-invariant packed weight halves its VMEM footprint
    (critical on v7x's 64 MiB VMEM); probed once on a trivial kernel so the real
    kernel can gracefully fall back to default double-buffering.
    """
    try:
        w_spec = pl.BlockSpec((8, 128), lambda i: (0, 0),
                              pipeline_mode=pl.Buffered(1))
    except Exception:
        return False

    def _probe(w_ref, x_ref, o_ref):
        o_ref[...] = x_ref[...] + w_ref[...]

    try:
        w = jnp.zeros((8, 128), jnp.float32)
        x = jnp.zeros((16, 128), jnp.float32)
        out = pl.pallas_call(
            _probe,
            grid=(2,),
            in_specs=[w_spec, pl.BlockSpec((8, 128), lambda i: (i, 0))],
            out_specs=pl.BlockSpec((8, 128), lambda i: (i, 0)),
            out_shape=jax.ShapeDtypeStruct((16, 128), jnp.float32),
        )(w, x)
        jax.block_until_ready(out)
        return True
    except Exception:
        return False


# --------------------------------------------------------------------------
# VMEM-budget-derived tiling
# --------------------------------------------------------------------------
def _pad_lanes(c: int) -> int:
    return ((c + 127) // 128) * 128


def _per_row_vmem_bytes(seq: int, ch: int) -> int:
    """Rough f32 VMEM bytes per batch row in one grid step: double-buffered flat
    in/out tiles + flat q/k/v + lane-padded (seq,ch)/(seq,seq) attention
    intermediates (last dims < 128 occupy a full 128-lane vreg row)."""
    d = seq * ch
    flat = (2 + 2 + 3) * d * 4
    padded = (4 * seq * _pad_lanes(ch) + 3 * seq * _pad_lanes(seq)) * 4
    return flat + padded


def _weight_vmem_bytes(d: int, single_buffer: bool) -> int:
    bufs = 1 if single_buffer else 2
    return bufs * (3 * d * _pad_lanes(d) * 2        # packed bf16 weights
                   + 8 * _pad_lanes(d) * 4)         # packed f32 biases (sublane-padded)


def _choose_batch_tile(n: int, seq: int, ch: int, *, vmem_budget_bytes: int) -> int:
    """Largest batch tile that (a) divides n, (b) keeps the estimated working set
    inside the VMEM budget, (c) prefers MXU-friendly multiples of 256 / 128.

    Falls back to n itself, which is always a legal BlockSpec because the block
    then equals the full array dim (the (8,128) rule only applies otherwise).
    """
    per_row = _per_row_vmem_bytes(seq, ch)
    max_rows = max(8, vmem_budget_bytes // per_row)
    # 512: per-step row target from the perf review; also bounds the per-step
    # unrolled batched attention matmuls at small (seq, ch).
    cap = int(min(max_rows, 512, n))
    candidates = [t for t in range(8, cap + 1, 8) if n % t == 0]
    if not candidates:
        return n
    for mult in (256, 128, 8):         # v6e/v7x MXU rows -> prefer 256, then 128
        friendly = [t for t in candidates if t % mult == 0]
        if friendly:
            return max(friendly)
    return max(candidates)


# --------------------------------------------------------------------------
# Fused kernel: one batch tile per grid step.
#   x_ref : (TB, D)    f32 flattened inputs (D = seq * ch), lane-dense
#   w_ref : (3, D, D)  bf16 packed [Wq; Wk; Wv]  (nn.Linear (out, in) layout)
#   b_ref : (3, D)     f32 packed [bq; bk; bv]
#   o_ref : (TB, D)    f32 flattened outputs
# --------------------------------------------------------------------------
def _fused_attention_kernel(x_ref, w_ref, b_ref, o_ref, *, seq, ch, scale,
                            approx_recip):
    tb, d = x_ref.shape
    x = x_ref[...]                                   # (TB, D) f32
    xb = x.astype(jnp.bfloat16)                      # MXU operand; accum stays f32

    def proj(idx):
        # Leading-axis (non-lane) indexing of the packed weight/bias: avoids
        # lane-offset slicing of a (TB, 3D) result, which would force a
        # relayout every grid step when D is not a multiple of 128.
        w = w_ref[idx]                               # (D, D) bf16
        b = b_ref[idx:idx + 1, :]                    # (1, D)  f32
        y = lax.dot_general(xb, w, (((1,), (1,)), ((), ())),
                            preferred_element_type=jnp.float32)
        return y + b                                 # (TB, D) f32

    q = proj(0) * scale                              # fold 1/sqrt(D) into q
    k = proj(1)
    v = proj(2)

    # Per-batch (seq, ch) views for the attention matmuls (bf16 in, f32 accum).
    qb = q.reshape(tb, seq, ch).astype(jnp.bfloat16)
    kb = k.reshape(tb, seq, ch).astype(jnp.bfloat16)
    vb = v.reshape(tb, seq, ch).astype(jnp.bfloat16)

    # s[b, i, j] = <q[b, i, :], k[b, j, :]>   (already scaled)
    # TODO(synk): for small seq*ch these batched contractions underfill the
    # 128/256-wide MXU; a batch-on-lanes VPU formulation (q/k/v transposed to
    # (seq, ch, TB), reductions over leading axes) would match the work to the
    # otherwise-idle VPU/XLU slots.  Kept on the MXU here: correct for all
    # shapes, and dominant only once seq*ch is large enough to fill it anyway.
    s = jnp.einsum("bic,bjc->bij", qb, kb,
                   preferred_element_type=jnp.float32)            # (TB, W, W)

    # softmax over the *query* axis i (== torch softmax(dim=1)), in f32.
    m = jnp.max(s, axis=1, keepdims=True)                         # (TB, 1, W)
    e = jnp.exp(s - m)
    denom = jnp.sum(e, axis=1, keepdims=True)                     # (TB, 1, W)
    if approx_recip:
        a = e * pl.reciprocal(denom, approx=True)                 # EUP slot, ~free
    else:
        a = e / denom

    # res[b, i, c] = sum_j a[b, i, j] * v[b, j, c]
    r = jnp.einsum("bij,bjc->bic", a.astype(jnp.bfloat16), vb,
                   preferred_element_type=jnp.float32)            # (TB, W, C)

    # Sigmoid + residual in the flat lane-dense layout: x is already flat and
    # the store wants (TB, D), so only r is reshaped (one relayout, not two).
    o_ref[...] = (jax.nn.sigmoid(r).reshape(tb, d) + x).astype(o_ref.dtype)


# --------------------------------------------------------------------------
# Wrapper
# --------------------------------------------------------------------------
def attention_block(x, params, *, approx_softmax_recip=True):
    """Fused AttentionBlock forward.

    x: (N, W, C) float32.  params = (wq, wk, wv, bq, bk, bv); weights (D, D)
    in nn.Linear (out, in) layout with D = W * C.
    """
    N, W, C = x.shape
    D = W * C
    wq, wk, wv, bq, bk, bv = params

    # Pack weights along a leading axis (indexed per projection in-kernel) and
    # pre-cast to bf16 in HBM: halves weight DMA traffic + VMEM residency; the
    # MXU accumulates in f32.  Biases / elementwise math stay f32.
    w_packed = jnp.stack([wq, wk, wv], axis=0).astype(jnp.bfloat16)   # (3, D, D)
    b_packed = jnp.stack([bq, bk, bv], axis=0).astype(jnp.float32)    # (3, D)

    # x stays f32 in HBM: it is needed exactly for the residual add; only the
    # in-kernel projection operand is cast to bf16.
    x_flat = x.reshape(N, D).astype(jnp.float32)                      # free reshape

    single_buffer = _single_buffer_supported()
    capacity = _vmem_capacity_bytes()
    weight_bytes = _weight_vmem_bytes(D, single_buffer)
    budget = max(4 << 20, int(capacity * 0.45) - weight_bytes)
    tb = _choose_batch_tile(N, W, C, vmem_budget_bytes=budget)
    assert N % tb == 0
    grid = (N // tb,)

    footprint = weight_bytes + tb * _per_row_vmem_bytes(W, C)
    vmem_limit = int(min(capacity * 3 // 4, max(32 << 20, 2 * footprint)))

    def _resident(shape):
        index_map = lambda b: (0,) * len(shape)
        if single_buffer:
            # Grid-invariant operand: fetched once; one buffer instead of two.
            return pl.BlockSpec(shape, index_map, pipeline_mode=pl.Buffered(1))
        return pl.BlockSpec(shape, index_map)

    kernel = functools.partial(
        _fused_attention_kernel, seq=W, ch=C, scale=1.0 / math.sqrt(D),
        approx_recip=approx_softmax_recip)

    out_flat = pl.pallas_call(
        kernel,
        grid=grid,
        in_specs=[
            pl.BlockSpec((tb, D), lambda b: (b, 0)),   # x tile (lane-dense)
            _resident((3, D, D)),                      # packed bf16 weights, VMEM-resident
            _resident((3, D)),                         # packed f32 biases
        ],
        out_specs=pl.BlockSpec((tb, D), lambda b: (b, 0)),
        out_shape=jax.ShapeDtypeStruct((N, D), jnp.float32),
        # NOTE: input_output_aliases dropped -- aliasing a reshape of a
        # non-donated input makes XLA insert a defensive copy before the call.
        compiler_params=pltpu.CompilerParams(
            # TODO(synk): on v7x verify in the schedule that "parallel" shards
            # the batch grid across both TensorCores; otherwise switch to
            # pltpu.CORE_PARALLEL (or a leading core axis via pl.core_map).
            dimension_semantics=("parallel",),
            vmem_limit_bytes=vmem_limit,
        ),
    )(x_flat, w_packed, b_packed)

    # TODO(synk): for very large D the resident 6*D^2-byte bf16 weight no longer
    # fits; the projection would need an inner K-tiled pipeline
    # (pltpu.emit_pipeline), and on v7x fp8 weights would halve traffic again.
    # TODO(synk): the show_alpha branch (host-side plot of the mean attention
    # matrix) is visualization-only with no Pallas equivalent; omitted.
    return out_flat.reshape(N, W, C)


# --------------------------------------------------------------------------
# Pure-JAX reference (mirrors the PyTorch forward) for a correctness check.
# --------------------------------------------------------------------------
def reference(x, params):
    N, W, C = x.shape
    D = W * C
    wq, wk, wv, bq, bk, bv = params
    xf = x.reshape(N, D)
    q = (xf @ wq.T + bq).reshape(N, W, C)
    k = (xf @ wk.T + bk).reshape(N, W, C)
    v = (xf @ wv.T + bv).reshape(N, W, C)
    alphas = jnp.einsum("nic,njc->nij", q, k) / math.sqrt(D)
    alphas = jax.nn.softmax(alphas, axis=1)       # torch softmax(dim=1)
    return jax.nn.sigmoid(jnp.einsum("nij,njc->nic", alphas, v)) + x


if __name__ == "__main__":
    # Small shapes consistent with the module: (N, W, C), key_size = W*C.
    N, W, C = 16, 8, 4
    D = W * C                      # key_size == value_size == 32

    key = jax.random.PRNGKey(0)
    kx, kq, kk, kv, kbq, kbk, kbv = jax.random.split(key, 7)

    x = jax.random.normal(kx, (N, W, C), dtype=jnp.float32)

    # nn.Linear default init: U(-1/sqrt(in), 1/sqrt(in)).
    bound = 1.0 / math.sqrt(D)
    wq = jax.random.uniform(kq, (D, D), jnp.float32, -bound, bound)
    wk = jax.random.uniform(kk, (D, D), jnp.float32, -bound, bound)
    wv = jax.random.uniform(kv, (D, D), jnp.float32, -bound, bound)
    bq = jax.random.uniform(kbq, (D,), jnp.float32, -bound, bound)
    bk = jax.random.uniform(kbk, (D,), jnp.float32, -bound, bound)
    bv = jax.random.uniform(kbv, (D,), jnp.float32, -bound, bound)
    params = (wq, wk, wv, bq, bk, bv)

    _single_buffer_supported()     # run the capability probe outside the jit

    out = jax.block_until_ready(jax.jit(attention_block)(x, params))
    ref = jax.block_until_ready(reference(x, params))

    assert out.shape == (N, W, C), out.shape
    err = float(jnp.max(jnp.abs(out - ref)))
    # bf16 matmul operands (f32 accumulation) + approx softmax reciprocal vs
    # the exact f32 reference.
    assert err < 3e-2, f"max abs err = {err}"
    print("KERNEL_OK")
</pallas_src>

<mosaic_0001>
module attributes {stable_mosaic.version = 11 : i64} {
  func.func @_probe(%arg0: i32, %arg1: memref<8x128xf32, #tpu.memory_space<vmem>>, %arg2: memref<8x128xf32, #tpu.memory_space<vmem>>, %arg3: memref<8x128xf32, #tpu.memory_space<vmem>>) attributes {dimension_semantics = [#tpu.dimension_semantics<arbitrary>], iteration_bounds = array<i64: 2>, scalar_prefetch = 0 : i64, scratch_operands = 0 : i64, tpu.core_type = #tpu.core_type<tc>, window_params = [{pipeline_mode = #tpu.pipeline_mode<synchronous>, transform_indices = @transform_0, window_bounds = array<i64: 8, 128>}, {transform_indices = @transform_1, window_bounds = array<i64: 8, 128>}, {transform_indices = @transform_2, window_bounds = array<i64: 8, 128>}]} {
    %c0 = arith.constant 0 : index
    %c0_0 = arith.constant 0 : index
    %0 = vector.load %arg2[%c0, %c0_0] : memref<8x128xf32, #tpu.memory_space<vmem>>, vector<8x128xf32>
    %c0_1 = arith.constant 0 : index
    %c0_2 = arith.constant 0 : index
    %1 = vector.load %arg1[%c0_1, %c0_2] : memref<8x128xf32, #tpu.memory_space<vmem>>, vector<8x128xf32>
    %2 = arith.addf %0, %1 : vector<8x128xf32>
    %c0_3 = arith.constant 0 : index
    %c0_4 = arith.constant 0 : index
    %3 = vector.load %arg3[%c0_3, %c0_4] : memref<8x128xf32, #tpu.memory_space<vmem>>, vector<8x128xf32>
    tpu.vector_store %arg3[%c0_3, %c0_4], %2 {strides = array<i32>} : memref<8x128xf32, #tpu.memory_space<vmem>>, vector<8x128xf32>,
    return
  }
  func.func @transform_0(%arg0: i32) -> (i32, i32) {
    %c0_i32 = arith.constant 0 : i32
    %c0_i32_0 = arith.constant 0 : i32
    %c0_i32_1 = arith.constant 0 : i32
    return %c0_i32, %c0_i32_0 : i32, i32
  }
  func.func @transform_1(%arg0: i32) -> (i32, i32) {
    %c0_i32 = arith.constant 0 : i32
    %c0_i32_0 = arith.constant 0 : i32
    return %arg0, %c0_i32 : i32, i32
  }
  func.func @transform_2(%arg0: i32) -> (i32, i32) {
    %c0_i32 = arith.constant 0 : i32
    %c0_i32_0 = arith.constant 0 : i32
    return %arg0, %c0_i32 : i32, i32
  }
}

module attributes {stable_mosaic.version = 11 : i64} {
  func.func @_fused_attention_kernel(%arg0: i32, %arg1: memref<16x32xf32, #tpu.memory_space<vmem>>, %arg2: memref<3x32x32xbf16, #tpu.memory_space<vmem>>, %arg3: memref<3x32xf32, #tpu.memory_space<vmem>>, %arg4: memref<16x32xf32, #tpu.memory_space<vmem>>) attributes {dimension_semantics = [#tpu.dimension_semantics<parallel>], iteration_bounds = array<i64: 1>, scalar_prefetch = 0 : i64, scratch_operands = 0 : i64, tpu.core_type = #tpu.core_type<tc>, window_params = [{transform_indices = @transform_0, window_bounds = array<i64: 16, 32>}, {pipeline_mode = #tpu.pipeline_mode<synchronous>, transform_indices = @transform_1, window_bounds = array<i64: 3, 32, 32>}, {pipeline_mode = #tpu.pipeline_mode<synchronous>, transform_indices = @transform_2, window_bounds = array<i64: 3, 32>}, {transform_indices = @transform_3, window_bounds = array<i64: 16, 32>}]} {
    %c0 = arith.constant 0 : index
    %c0_0 = arith.constant 0 : index
    %0 = vector.load %arg1[%c0, %c0_0] : memref<16x32xf32, #tpu.memory_space<vmem>>, vector<16x32xf32>
    %1 = arith.truncf %0 : vector<16x32xf32> to vector<16x32xbf16>
    %c0_1 = arith.constant 0 : index
    %c0_2 = arith.constant 0 : index
    %c0_3 = arith.constant 0 : index
    %2 = vector.load %arg2[%c0_1, %c0_2, %c0_3] : memref<3x32x32xbf16, #tpu.memory_space<vmem>>, vector<1x32x32xbf16>
    %3 = vector.shape_cast %2 : vector<1x32x32xbf16> to vector<32x32xbf16>
    %c0_4 = arith.constant 0 : index
    %c0_5 = arith.constant 0 : index
    %4 = vector.load %arg3[%c0_4, %c0_5] : memref<3x32xf32, #tpu.memory_space<vmem>>, vector<1x32xf32>
    %cst = arith.constant dense<0.000000e+00> : vector<16x32xf32>
    %5 = tpu.matmul %1, %3, %cst {dimension_numbers = #tpu.dot_dimension_numbers<[1], [1], [0], [0], [0, 0, 1, 0], [], []>} : vector<16x32xbf16>, vector<32x32xbf16>, vector<16x32xf32> -> vector<16x32xf32>
    %6 = vector.broadcast %4 : vector<1x32xf32> to vector<16x32xf32>
    %7 = arith.addf %5, %6 : vector<16x32xf32>
    %cst_6 = arith.constant 0.176776692 : f32
    %8 = vector.broadcast %cst_6 : f32 to vector<16x32xf32>
    %9 = arith.mulf %7, %8 : vector<16x32xf32>
    %c1 = arith.constant 1 : index
    %c0_7 = arith.constant 0 : index
    %c0_8 = arith.constant 0 : index
    %10 = vector.load %arg2[%c1, %c0_7, %c0_8] : memref<3x32x32xbf16, #tpu.memory_space<vmem>>, vector<1x32x32xbf16>
    %11 = vector.shape_cast %10 : vector<1x32x32xbf16> to vector<32x32xbf16>
    %c1_9 = arith.constant 1 : index
    %c0_10 = arith.constant 0 : index
    %12 = vector.load %arg3[%c1_9, %c0_10] : memref<3x32xf32, #tpu.memory_space<vmem>>, vector<1x32xf32>
    %cst_11 = arith.constant dense<0.000000e+00> : vector<16x32xf32>
    %13 = tpu.matmul %1, %11, %cst_11 {dimension_numbers = #tpu.dot_dimension_numbers<[1], [1], [0], [0], [0, 0, 1, 0], [], []>} : vector<16x32xbf16>, vector<32x32xbf16>, vector<16x32xf32> -> vector<16x32xf32>
    %14 = vector.broadcast %12 : vector<1x32xf32> to vector<16x32xf32>
    %15 = arith.addf %13, %14 : vector<16x32xf32>
    %c2 = arith.constant 2 : index
    %c0_12 = arith.constant 0 : index
    %c0_13 = arith.constant 0 : index
    %16 = vector.load %arg2[%c2, %c0_12, %c0_13] : memref<3x32x32xbf16, #tpu.memory_space<vmem>>, vector<1x32x32xbf16>
    %17 = vector.shape_cast %16 : vector<1x32x32xbf16> to vector<32x32xbf16>
    %c2_14 = arith.constant 2 : index
    %c0_15 = arith.constant 0 : index
    %18 = vector.load %arg3[%c2_14, %c0_15] : memref<3x32xf32, #tpu.memory_space<vmem>>, vector<1x32xf32>
    %cst_16 = arith.constant dense<0.000000e+00> : vector<16x32xf32>
    %19 = tpu.matmul %1, %17, %cst_16 {dimension_numbers = #tpu.dot_dimension_numbers<[1], [1], [0], [0], [0, 0, 1, 0], [], []>} : vector<16x32xbf16>, vector<32x32xbf16>, vector<16x32xf32> -> vector<16x32xf32>
    %20 = vector.broadcast %18 : vector<1x32xf32> to vector<16x32xf32>
    %21 = arith.addf %19, %20 : vector<16x32xf32>
    %22 = vector.shape_cast %9 : vector<16x32xf32> to vector<16x8x4xf32>
    %23 = arith.truncf %22 : vector<16x8x4xf32> to vector<16x8x4xbf16>
    %24 = vector.shape_cast %15 : vector<16x32xf32> to vector<16x8x4xf32>
    %25 = arith.truncf %24 : vector<16x8x4xf32> to vector<16x8x4xbf16>
    %26 = vector.shape_cast %21 : vector<16x32xf32> to vector<16x8x4xf32>
    %27 = arith.truncf %26 : vector<16x8x4xf32> to vector<16x8x4xbf16>
    "tpu.trace_start"() <{level = 10 : i32, message = "bic,bjc->bij"}> : () -> ()
    %cst_17 = arith.constant dense<0.000000e+00> : vector<16x8x8xf32>
    %28 = tpu.matmul %23, %25, %cst_17 {dimension_numbers = #tpu.dot_dimension_numbers<[2], [2], [1], [1], [0, 0, 0, 1, 1, 1], [0], [0]>} : vector<16x8x4xbf16>, vector<16x8x4xbf16>, vector<16x8x8xf32> -> vector<16x8x8xf32>
    "tpu.trace_stop"() : () -> ()
    %cst_18 = arith.constant dense<0xFF800000> : vector<16x8xf32>
    %29 = vector.multi_reduction <maximumf>, %28, %cst_18 [1] : vector<16x8x8xf32> to vector<16x8xf32>
    %30 = vector.shape_cast %29 : vector<16x8xf32> to vector<16x1x8xf32>
    %31 = vector.broadcast %30 : vector<16x1x8xf32> to vector<16x8x8xf32>
    %32 = arith.subf %28, %31 : vector<16x8x8xf32>
    %33 = math.exp %32 : vector<16x8x8xf32>
    %cst_19 = arith.constant dense<0.000000e+00> : vector<16x8xf32>
    %34 = vector.multi_reduction <add>, %33, %cst_19 [1] : vector<16x8x8xf32> to vector<16x8xf32>
    %35 = vector.shape_cast %34 : vector<16x8xf32> to vector<16x1x8xf32>
    %36 = tpu.reciprocal %35 {approx = true} : vector<16x1x8xf32> -> vector<16x1x8xf32>
    %37 = vector.broadcast %36 : vector<16x1x8xf32> to vector<16x8x8xf32>
    %38 = arith.mulf %33, %37 : vector<16x8x8xf32>
    %39 = arith.truncf %38 : vector<16x8x8xf32> to vector<16x8x8xbf16>
    "tpu.trace_start"() <{level = 10 : i32, message = "bij,bjc->bic"}> : () -> ()
    %cst_20 = arith.constant dense<0.000000e+00> : vector<16x8x4xf32>
    %40 = tpu.matmul %39, %27, %cst_20 {dimension_numbers = #tpu.dot_dimension_numbers<[2], [1], [1], [2], [0, 0, 0, 1, 1, 2], [0], [0]>} : vector<16x8x8xbf16>, vector<16x8x4xbf16>, vector<16x8x4xf32> -> vector<16x8x4xf32>
    "tpu.trace_stop"() : () -> ()
    %41 = arith.negf %40 : vector<16x8x4xf32>
    %42 = math.exp %41 : vector<16x8x4xf32>
    %cst_21 = arith.constant 1.000000e+00 : f32
    %43 = vector.broadcast %cst_21 : f32 to vector<16x8x4xf32>
    %44 = arith.addf %43, %42 : vector<16x8x4xf32>
    %45 = arith.divf %43, %44 : vector<16x8x4xf32>
    %46 = vector.shape_cast %45 : vector<16x8x4xf32> to vector<16x32xf32>
    %47 = arith.addf %46, %0 : vector<16x32xf32>
    %c0_22 = arith.constant 0 : index
    %c0_23 = arith.constant 0 : index
    %48 = vector.load %arg4[%c0_22, %c0_23] : memref<16x32xf32, #tpu.memory_space<vmem>>, vector<16x32xf32>
    tpu.vector_store %arg4[%c0_22, %c0_23], %47 {strides = array<i32>} : memref<16x32xf32, #tpu.memory_space<vmem>>, vector<16x32xf32>,
    return
  }
  func.func @transform_0(%arg0: i32) -> (i32, i32) {
    %c0_i32 = arith.constant 0 : i32
    %c0_i32_0 = arith.constant 0 : i32
    return %arg0, %c0_i32 : i32, i32
  }
  func.func @transform_1(%arg0: i32) -> (i32, i32, i32) {
    %c0_i32 = arith.constant 0 : i32
    %c0_i32_0 = arith.constant 0 : i32
    %c0_i32_1 = arith.constant 0 : i32
    %c0_i32_2 = arith.constant 0 : i32
    return %c0_i32, %c0_i32_0, %c0_i32_1 : i32, i32, i32
  }
  func.func @transform_2(%arg0: i32) -> (i32, i32) {
    %c0_i32 = arith.constant 0 : i32
    %c0_i32_0 = arith.constant 0 : i32
    %c0_i32_1 = arith.constant 0 : i32
    return %c0_i32, %c0_i32_0 : i32, i32
  }
  func.func @transform_3(%arg0: i32) -> (i32, i32) {
    %c0_i32 = arith.constant 0 : i32
    %c0_i32_0 = arith.constant 0 : i32
    return %arg0, %c0_i32 : i32, i32
  }
}

</mosaic_0001>

<bundles_post_ra>
// kernel: tpu_custom_call.1
= control target key start
LH: loop header
LB: loop body
LE: loop exit
PB: predicated region body
PF: predicated region fallthrough
CT: control target
= control target key end

     0   :  { %7 = vsyncpa [#allocation3], 0  ;;  %s692_s0 = inlined_call_operand.hbm [shape: f32[8,128], index: 0, kind: input, shape index: {}]   ;;  %s693_s1 = inlined_call_operand.hbm [shape: f32[16,128], index: 1, kind: input, shape index: {}]   ;;  %s694_s2 = inlined_call_operand.hbm [shape: f32[16,128], index: 2, kind: output, shape index: {}]  }
   0x1   :  { %8 = vsyncpa [#allocation6], 0 }
   0x2   :  { %10 = vsyncpa [#allocation6 + $0x1], 0 }
   0x3   :  { %11 = vsyncpa [#allocation4], 0 }
   0x4   :  { %13 = vsyncpa [#allocation4 + $0x1], 0  ;;  %s491_s9 = smov 0   ;;  %s493_s10 = smov 0  }
   0x5   :  { %s495_s11 = smov 0   ;;  %s497_s12 = smov 0  }
   0x6 LB: > { %s512_s13 = sadd.s32 4294967295, %s471_s12   ;;  %s272_s14 = sadd.s32 4294967294, %s471_s12   ;;  %s471_s12 = sphi %s497_s12, %s718_s12   ;;  %s467_s11 = sphi %s495_s11, %s717_s11   ;;  %s463_s10 = sphi %s493_s10, %s716_s10   ;;  %s459_s9 = sphi %s491_s9, %s715_s9  }
   0x7   : > { %p60_p0 = scmp.ne.s32.totalorder %s463_s10, %s459_s9  ;;  %p695_p1 = scmp.eq.s32.totalorder %s512_s13, 0 }
   0x8   : > { %p90_p3 = scmp.eq.s32.totalorder %s272_s14, 1  ;;  %p273_p5 = scmp.ge.s32.totalorder %s471_s12, 1 }
   0x9   : > { %p521_p4 = por %p695_p1, %p60_p0  ;;  %p97_p7 = scmp.lt.s32.totalorder %s471_s12, 3 }
   0xa   : > { %p526_p6 = por %p90_p3, %p60_p0  ;;  %s473_s18 = smov [#allocation2]  }
   0xb   : > { %s698_s15 = scalar_select %p521_p4, 1, 0 }
   0xc   : > { %s699_s16 = scalar_select %p526_p6, 1, 0 }
   0xd   : > { %p531_p8 = pnand %p273_p5, %p97_p7  ;;  %s110_s19 = sshll.u32 %s473_s18, 4  ;;  %s111_s19 = int_to_ptr.vmem [resolvable:$true] %s110_s19 }
   0xe   : > { %s539_s20 = sadd.s32 1, %s471_s12   ;;  %s47_s24 = sadd.s32 1, %s467_s11 }
   0xf   : > { %s700_s17 = scalar_select %p531_p8, 1, 0 }
  0x10   : > { %p294_p10 = pneg %p531_p8  ;;  %s44_s22 = ssub.s32 %s471_s12, %s539_s20 }
  0x11   : > { %p549_p12 = scmp.eq.s32.totalorder %s44_s22, 0  ;;  %s343_s27 = scalar_lea.hbm %s692_s0, 128 }
  0x12   : > { %p543_p11 = pnand %p294_p10, %p695_p1  ;;  %p344_p0 = scmp.ne.s32.totalorder %s692_s0, %s343_s27 }
  0x13   : > { %s702_s23 = scalar_select %p549_p12, 1, 0 }
  0x14   : > { %p345_p3 = pneg %p543_p11  ;;  %p350_p10 = scmp.lt.u32.totalorder %s343_s27, %s692_s0 }
  0x16   : > { %p346_p5 = pnand %p345_p3, %p344_p0 }
  0x18   : > { %p347_p7 = pneg %p346_p5 }
  0x1a   : > { %p352_p9 = pnand %p350_p10, %p347_p7 }
  0x1c   : > { %355 = shalt.err (!%p352_p9)
}
  0x1d   : > { %s356_s4 = scalar_lea.vmem %s111_s19, 128  ;;  %p364_p6 = scmp.lt.s32.totalorder %s111_s19, %s111_s19 }
  0x1e   : > { %p357_p1 = scmp.ne.s32.totalorder %s111_s19, %s356_s4  ;;  %p365_p4 = scmp.lt.s32.totalorder %s356_s4, %s356_s4 }
  0x20   : > { %p359_p2 = pnand %p357_p1, %p345_p3  ;;  %p366_p8 = por %p365_p4, %p364_p6 }
  0x22   : > { %p360_p13 = pneg %p359_p2 }
  0x24   : > { %p367_p12 = pnand %p366_p8, %p360_p13 }
  0x26   : > { %370 = shalt.err (!%p367_p12)
}
  0x27   : > { %297 = dma.hbm_to_vmem [thread:$0]  (!%p543_p11), %s692_s0, 128, %s111_s19, [#allocation3]  }
  0x28   : > { %p703_p1 = scmp.ne.s32.totalorder %s702_s23, 0  ;;  %p55_p2 = scmp.eq.s32.totalorder %s471_s12, 0 }
  0x29   : > { %p704_p4 = scmp.ne.s32.totalorder %s467_s11, %s463_s10  ;;  %p705_p6 = scmp.eq.s32.totalorder %s512_s13, 1 }
  0x2a   : > { %s575_s7 = scalar_select %p703_p1, %s467_s11, %s47_s24  }
  0x2b   : > { %p583_p8 = por %p705_p6, %p704_p4  ;;  %p307_p9 = scmp.lt.s32.totalorder %s471_s12, 2 }
  0x2c   : > { %s121_s14 = sand.u32 1, %s467_s11   ;;  %p707_p12 = pmov %p704_p4 }
  0x2d   : > { %s276_s18 = sshll.u32 %s121_s14, 3  ;;  %s277_s21 = sshll.u32 %s471_s12, 7 }
  0x2e   : > { %p56_p13 = por %p55_p2, %p707_p12  ;;  %s596_s19 = scalar_lea.hbm %s693_s1, %s277_s21 }
  0x2f   : > { %s125_s23 = scalar_lea.vmem [#allocation5], %s276_s18  ;;  %s122_s27 = scalar_lea.sflag [#allocation6], %s121_s14 }
  0x30   : > { %s132_s24 = sshll.u32 %s125_s23, 4  ;;  %p598_p11 = pnand %p307_p9, %p56_p13  ;;  %s602_s24 = int_to_ptr.vmem [resolvable:$true] %s132_s24 }
  0x31   : > { %s371_s28 = scalar_lea.hbm %s596_s19, 128  ;;  %s376_s3 = scalar_lea.hbm %s693_s1, 256 }
  0x32   : > { %p372_p0 = scmp.ne.s32.totalorder %s596_s19, %s371_s28  ;;  %p373_p3 = pneg %p598_p11 }
  0x33   : > { %p377_p10 = scmp.lt.u32.totalorder %s596_s19, %s693_s1  ;;  %p378_p1 = scmp.lt.u32.totalorder %s376_s3, %s371_s28 }
  0x34   : > { %p374_p5 = pnand %p373_p3, %p372_p0  ;;  %p380_p4 = scmp.lt.u32.totalorder %s371_s28, %s596_s19 }
  0x35   : > { %p379_p2 = por %p378_p1, %p377_p10 }
  0x36   : > { %p375_p7 = pneg %p374_p5 }
  0x37   : > { %p381_p6 = por %p380_p4, %p379_p2 }
  0x39   : > { %p382_p9 = pnand %p381_p6, %p375_p7 }
  0x3b   : > { %385 = shalt.err (!%p382_p9)
}
  0x3c   : > { %s386_s6 = scalar_lea.vmem %s602_s24, 128  ;;  %s474_s14 = smov [#allocation5]  }
  0x3d   : > { %p387_p12 = scmp.ne.s32.totalorder %s602_s24, %s386_s6  ;;  %s391_s18 = sshll.u32 %s474_s14, 4  ;;  %s392_s18 = int_to_ptr.vmem [resolvable:$false] %s391_s18 }
  0x3e   : > { %s393_s21 = scalar_lea.vmem %s392_s18, 256  ;;  %p394_p5 = scmp.lt.s32.totalorder %s602_s24, %s392_s18 }
  0x3f   : > { %p389_p13 = pnand %p387_p12, %p373_p3  ;;  %p395_p10 = scmp.lt.s32.totalorder %s393_s21, %s386_s6 }
  0x41   : > { %p390_p0 = pneg %p389_p13  ;;  %p396_p1 = por %p395_p10, %p394_p5 }
  0x43   : > { %p397_p2 = pnand %p396_p1, %p390_p0 }
  0x45   : > { %400 = shalt.err (!%p397_p2)
}
  0x46   : > { %301 = dma.hbm_to_vmem [thread:$0]  (!%p598_p11), %s596_s19, 128, %s602_s24, %s122_s27  }
  0x47   : > { %p709_p7 = scmp.ne.s32.totalorder %s700_s17, 0 }
  0x48   : > { %p710_p3 = scmp.eq.s32.totalorder (!%p709_p7), %s512_s13, 0 }
  0x49   : > { %141 = sbr.rel (%p709_p7) target bundleno = 110 (0x6e), region = 28 }
  0x50   : > { %446 = dma.done.wait (%p710_p3), [#allocation3], 128   ;;  %p711_p4 = pmov %p710_p3 }
  0x51   : > { %s636_s22 = sand.u32 1, %s463_s10   ;;  %p712_p6 = scmp.ne.s32.totalorder %s698_s15, 0 }
  0x52   : > { %448 = vsyncadd (%p711_p4), [#allocation3], 4294967168  ;;  %s280_s25 = sshll.u32 %s636_s22, 3  ;;  %s148_s23 = scalar_lea.sflag [#allocation6], %s636_s22 }
  0x53   : > { %s151_s26 = scalar_lea.vmem [#allocation5], %s280_s25 }
  0x54   : > { %450 = dma.done.wait (%p712_p6), %s148_s23, 128  }
  0x55   : > { %452 = vsyncadd (%p712_p6), %s148_s23, 4294967168  ;;  %s171_s17 = scalar_lea.vmem [#allocation7], %s280_s25  ;;  %s283_s24 = sshll.u32 %s512_s13, 7  ;;  %v172_v0 = vld [vmem:[%s151_s26] sm:$0xff]  ;;  %v173_v1 = vld [vmem:[#allocation2] sm:$0xff] }
  0x56   : > { %s190_s19 = sshll.u32 %s171_s17, 4  ;;  %v174_v2 = vadd.f32 %v173_v1, %v172_v0  ;;  %s650_s29 = scalar_lea.hbm %s694_s2, %s283_s24  ;;  %s645_s19 = int_to_ptr.vmem [resolvable:$true] %s190_s19 }
  0x57   : > { %s177_s15 = scalar_lea.sflag [#allocation4], %s636_s22  ;;  %s401_s30 = scalar_lea.vmem %s645_s19, 128 }
  0x58   : > { %175 = vst [vmem:[%s171_s17] sm:$0xff] %v174_v2  ;;  %p402_p11 = scmp.ne.s32.totalorder %s645_s19, %s401_s30  ;;  %s475_s13 = smov [#allocation7]  }
  0x59   : > { %s405_s3 = sshll.u32 %s475_s13, 4  ;;  %s406_s3 = int_to_ptr.vmem [resolvable:$false] %s405_s3 }
  0x5a   : > { %p403_p9 = pnand %p402_p11, %p583_p8  ;;  %s407_s4 = scalar_lea.vmem %s406_s3, 256 }
  0x5b   : > { %p408_p13 = scmp.lt.s32.totalorder %s645_s19, %s406_s3  ;;  %p409_p0 = scmp.lt.s32.totalorder %s407_s4, %s401_s30 }
  0x5c   : > { %p404_p12 = pneg %p403_p9 }
  0x5d   : > { %p410_p5 = por %p409_p0, %p408_p13 }
  0x5f   : > { %p411_p10 = pnand %p410_p5, %p404_p12 }
  0x61   : > { %414 = shalt.err (!%p411_p10)
}
  0x62   : > { %s415_s5 = scalar_lea.hbm %s650_s29, 128  ;;  %s419_s18 = scalar_lea.hbm %s694_s2, 256 }
  0x63   : > { %p416_p1 = scmp.ne.s32.totalorder %s650_s29, %s415_s5  ;;  %p420_p3 = scmp.lt.u32.totalorder %s650_s29, %s694_s2 }
  0x64   : > { %p421_p4 = scmp.lt.u32.totalorder %s419_s18, %s415_s5  ;;  %p423_p11 = scmp.lt.u32.totalorder %s415_s5, %s650_s29 }
  0x65   : > { %p417_p2 = pnand %p416_p1, %p583_p8 }
  0x66   : > { %p422_p6 = por %p421_p4, %p420_p3 }
  0x67   : > { %p418_p7 = pneg %p417_p2 }
  0x68   : > { %p424_p9 = por %p423_p11, %p422_p6 }
  0x6a   : > { %p425_p12 = pnand %p424_p9, %p418_p7 }
  0x6c   : > { %428 = shalt.err (!%p425_p12)
}
  0x6d   : > { %292 = dma.vmem_to_hbm [thread:$0]  (%p583_p8), %s645_s19, 128, %s650_s29, %s177_s15  }
  0x6e PF: > { %s202_s25 = sand.u32 1, %s459_s9   ;;  %p713_p13 = scmp.ne.s32.totalorder %s699_s16, 0 }
  0x6f   : > { %p714_p0 = scmp.ge.s32.totalorder %s471_s12, 2  ;;  %s203_s23 = scalar_lea.sflag [#allocation4], %s202_s25 }
  0x71   : > { %p303_p5 = pnand %p714_p0, %p713_p13 }
  0x73   : > { %454 = dma.done.wait (!%p303_p5), %s203_s23, 128  }
  0x74   : > { %456 = vsyncadd (!%p303_p5), %s203_s23, 4294967168  ;;  %p16_p10 = scmp.ge.s32.totalorder %s539_s20, 4   ;;  %s715_s9 = smov %s463_s10 }
  0x75   : > { %s716_s10 = smov %s467_s11  ;;  %s717_s11 = smov %s575_s7 }
  0x76   : > { %s718_s12 = smov %s539_s20  ;;  %18 = sbr.rel (!%p16_p10) target bundleno = 6 (0x6), region = 78 }
  0x7d   :  { %208 = vsyncpa [#allocation3], 1 }
  0x7e   :  { %210 = vsyncpa [#allocation3 + $0x1], 1 }
  0x7f   :  { %211 = vsyncpa [#allocation6], 1 }
  0x80   :  { %213 = vsyncpa [#allocation6 + $0x1], 1 }
  0x81   :  { %214 = vsyncpa [#allocation4], 1 }
  0x82   :  { %216 = vsyncpa [#allocation4 + $0x1], 1 }

// kernel: attention_block.1
= control target key start
LH: loop header
LB: loop body
LE: loop exit
PB: predicated region body
PF: predicated region fallthrough
CT: control target
= control target key end

     0   :  { %vm37_vm0 = vcmask 261120   ;;  %v3977_v0 = vmov 0.0   ;;  %vm3978_vm1 = vmmov 0   ;;  %s3980_s30 = smov 124   ;;  %s3981_s6 = smov 112   ;;  %v273_v42 = vlaneseq  ;;  %s4938_s1 = inlined_call_operand.vmem [shape: bf16[3,32,32], index: 1, kind: input, shape index: {}]   ;;  %s4939_s0 = inlined_call_operand.vmem [shape: f32[16,32], index: 0, kind: input, shape index: {}]   ;;  %s4940_s2 = inlined_call_operand.vmem [shape: f32[3,32], index: 2, kind: input, shape index: {}]   ;;  %s4941_s3 = inlined_call_operand.vmem [shape: f32[16,32], index: 3, kind: output, shape index: {}]  }
   0x1   :  { %3615 = vmatprep.subr.bf16.mxu1 %v3977_v0  ;;  %v3841_v1 = vld [vmem:[%s4938_s1 + $0x10] sm:$0xff]   ;;  %3607 = vmatprep.subr.bf16.mxu0 %v3977_v0  ;;  %v3842_v2 = vld [vmem:[%s4938_s1] sm:$0xff]   ;;  %v3843_v5 = vld [vmem:[%s4938_s1 + $0x18] sm:$0xff]   ;;  %s3982_s7 = smov 120   ;;  %s3983_s8 = smov 104   ;;  %vm1220_vm2 = vcmask 31744  }
   0x2   :  { %3619 = vmatprep.mubr.msk.bf16.mxu1 %vm3978_vm1, %v3977_v0  ;;  %3611 = vmatprep.mubr.msk.bf16.mxu0 %vm3978_vm1, %v3977_v0  ;;  %v111_v3 = vsel %vm37_vm0, %v3841_v1, 0  ;;  %v42_v4 = vsel %vm37_vm0, %v3842_v2, 0  ;;  %v3844_v6 = vld [vmem:[%s4938_s1 + $0x8] sm:$0xff]   ;;  %v114_v7 = vsel %vm37_vm0, %v3843_v5, 0  ;;  %v15_v9 = vld [vmem:[%s4939_s0] sm:$0xff]  ;;  %s3984_s9 = smov 108  }
   0x3   :  { %3616 = vmatpush3.bf16.xpose.msra.mxu1 %v111_v3  ;;  %3608 = vmatpush3.bf16.xpose.msra.mxu0 %v42_v4  ;;  %v45_v8 = vsel %vm37_vm0, %v3844_v6, 0  ;;  %v16_v10 = vld [vmem:[%s4939_s0 + $0x8] sm:$0xff]  ;;  %v3845_v11 = vld [vmem:[%s4938_s1 + $0x20] sm:$0xff]   ;;  %s3985_s10 = smov 100   ;;  %v3986_v40 = vmov 1983009808  }
   0x4   :  { %3617 = vmatprep.subr.bf16.mxu1 %v3977_v0  ;;  %3609 = vmatprep.subr.bf16.mxu0 %v3977_v0  ;;  %v17_v12 = vpack.c.bf16 %v16_v10, %v15_v9  ;;  %v178_v13 = vsel %vm37_vm0, %v3845_v11, 0  ;;  %v3846_v14 = vld [vmem:[%s4938_s1 + $0x28] sm:$0xff]   ;;  %v3474_v16 = vld [vmem:[%s4940_s2 + $0x1] ss:$0 sm:$0xff]  ;;  %s3979_s1 = smov 116   ;;  %v271_v41 = vunpack.c.l.s4 %v3986_v40  ;;  %v274_v45 = vshrl.u32 %v273_v42, 7 }
   0x5   :  { %v181_v15 = vsel %vm37_vm0, %v3846_v14, 0  ;;  %v3466_v25 = vld [vmem:[%s4940_s2] ss:$0 sm:$0xff]  ;;  %v3482_v36 = vld [vmem:[%s4940_s2 + $0x2] ss:$0 sm:$0xff]  ;;  %vm2281_vm3 = vcmask 1043456  }
   0x6   :  { %v272_v44 = vunpack.c.0.s8 %v271_v41  ;;  %v3987_v48 = vmov 1934713408   ;;  %vm1957_vm4 = vcmask 64512   ;;  %s3988_s2 = smov 4   ;;  %s3989_s13 = smov 8   ;;  %vm3443_vm5 = vcmask 97280  }
   0x7   :  { %v335_v49 = vunpack.c.l.s4 %v3987_v48  ;;  %s3990_s14 = smov 12   ;;  %s3991_s15 = smov 16   ;;  %vm3446_vm6 = vcmask 130048   ;;  %vm3449_vm7 = vcmask 162816   ;;  %vm3452_vm8 = vcmask 195584  }
   0x8   :  { %v4172_v51 = vsub.s32 %v272_v44, %v274_v45  ;;  %s3992_s16 = smov 20   ;;  %s3993_s17 = smov 24   ;;  %vm3455_vm9 = vcmask 228352  }
   0x9   :  { %v336_v55 = vunpack.c.0.s8 %v335_v49  ;;  %s3994_s18 = smov 28  }
   0xb   :  { %3618 = vmatpush3.bf16.xpose.msra.mxu1 %v114_v7  ;;  %3610 = vmatpush3.bf16.xpose.msra.mxu0 %v45_v8  ;;  %v4178_v62 = vsub.s32 %v336_v55, %v274_v45 }
   0xc   :  { %3631 = vmatprep.subr.bf16.mxu1 %v3977_v0  ;;  %3623 = vmatprep.subr.bf16.mxu0 %v3977_v0 }
  0x12   :  { %3620 = vmatmul.mubr.msk.bf16.vlgmr.msra.gmra.mrb[0].mxu1 %vm37_vm0, %v17_v12  ;;  %3612 = vmatmul.mubr.msk.bf16.vlgmr.msra.gmra.mrb[0].mxu0 %vm37_vm0, %v17_v12 }
  0x13   :  { %3633 = vmatprep.mubr.msk.bf16.mxu1 %vm3978_vm1, %v3977_v0  ;;  %3624 = vmatpush3.bf16.xpose.msra.mxu0 %v178_v13 }
  0x14   :  { %3627 = vmatprep.mubr.msk.bf16.mxu0 %vm3978_vm1, %v3977_v0  ;;  %3625 = vmatprep.subr.bf16.mxu0 %v3977_v0 }
  0x1b   :  { %3626 = vmatpush3.bf16.xpose.msra.mxu0 %v181_v15 }
  0x1c   :  { %3643 = vmatprep.subr.bf16.mxu0 %v3977_v0 }
  0x22   :  { %3628 = vmatmul.mubr.msk.bf16.vlgmr.msra.gmra.mrb[4].mxu0 %vm37_vm0, %v17_v12 }
  0x23   :  { %3645 = vmatprep.mubr.msk.bf16.mxu0 %vm3978_vm1, %v3977_v0 }
  0xe5   :  { %v150_v17 = vpop.f32.mrb[0].mxu1  ;;  %v81_v20 = vpop.f32.mrb[0].mxu0 }
  0xe6   :  { %v4069_v18 = vadd.f32 %v3474_v16, %v150_v17  ;;  %v3621_v19 = vpop.f32.mrb[1].mxu1  ;;  %v3613_v22 = vpop.f32.mrb[1].mxu0  ;;  %v82_v27 = vadd.f32 %v3466_v25, %v81_v20 }
  0xe7   :  { %v153_v21 = vpop.f32.mrb[2].mxu1  ;;  %v84_v24 = vpop.f32.mrb[2].mxu0 }
  0xe8   :  { %570 = vrot.lane.b32.xlu1 %v4069_v18, %s3979_s1  ;;  %558 = vrot.lane.b32.xlu0 %v4069_v18, %s3980_s30  ;;  %v3622_v23 = vpop.f32.mrb[3].mxu1  ;;  %v3614_v26 = vpop.f32.mrb[3].mxu0  ;;  %v4082_v28 = vmul.f32 0.17677669, %v82_v27  ;;  %v4104_v31 = vadd.f32 %v3474_v16, %v153_v21  ;;  %v85_v34 = vadd.f32 %v3466_v25, %v84_v24 }
  0xea   :  { %v4118_v35 = vmul.f32 0.17677669, %v85_v34 }
  0xec   :  { %576 = vrot.lane.b32.xlu1 %v4069_v18, %s3981_s6  ;;  %564 = vrot.lane.b32.xlu0 %v4069_v18, %s3982_s7 }
  0xf0   :  { %588 = vrot.lane.b32.xlu1 %v4069_v18, %s3983_s8  ;;  %582 = vrot.lane.b32.xlu0 %v4069_v18, %s3984_s9 }
  0xf4   :  { %594 = vrot.lane.b32.xlu0 %v4069_v18, %s3985_s10  ;;  %226 = vrot.lane.b32.xlu1 %v4082_v28, %s3980_s30 }
  0xf5   :  { %v217_v29 = vpop.f32.mrb[4].mxu0 }
  0xf6   :  { %v3629_v30 = vpop.f32.mrb[5].mxu0  ;;  %v4139_v37 = vadd.f32 %v3482_v36, %v217_v29 }
  0xf7   :  { %v220_v32 = vpop.f32.mrb[6].mxu0 }
  0xf8   :  { %232 = vrot.lane.b32.xlu0 %v4082_v28, %s3982_s7  ;;  %238 = vrot.lane.b32.xlu1 %v4082_v28, %s3979_s1  ;;  %v3630_v33 = vpop.f32.mrb[7].mxu0  ;;  %v4153_v38 = vadd.f32 %v3482_v36, %v220_v32 }
  0xfc   :  { %244 = vrot.lane.b32.xlu0 %v4082_v28, %s3981_s6  ;;  %250 = vrot.lane.b32.xlu1 %v4082_v28, %s3984_s9 }
 0x100   :  { %256 = vrot.lane.b32.xlu0 %v4082_v28, %s3983_s8  ;;  %262 = vrot.lane.b32.xlu1 %v4082_v28, %s3985_s10 }
 0x104   :  { %560 = vrot.lane.b32.xlu0 %v4104_v31, %s3980_s30  ;;  %566 = vrot.lane.b32.xlu1 %v4104_v31, %s3982_s7 }
 0x108   :  { %572 = vrot.lane.b32.xlu0 %v4104_v31, %s3979_s1  ;;  %578 = vrot.lane.b32.xlu1 %v4104_v31, %s3981_s6 }
 0x10c   :  { %584 = vrot.lane.b32.xlu0 %v4104_v31, %s3984_s9  ;;  %590 = vrot.lane.b32.xlu1 %v4104_v31, %s3983_s8 }
 0x110   :  { %596 = vrot.lane.b32.xlu0 %v4104_v31, %s3985_s10  ;;  %228 = vrot.lane.b32.xlu1 %v4118_v35, %s3980_s30 }
 0x114   :  { %234 = vrot.lane.b32.xlu0 %v4118_v35, %s3982_s7  ;;  %240 = vrot.lane.b32.xlu1 %v4118_v35, %s3979_s1 }
 0x118   :  { %246 = vrot.lane.b32.xlu0 %v4118_v35, %s3981_s6  ;;  %252 = vrot.lane.b32.xlu1 %v4118_v35, %s3984_s9 }
 0x11c   :  { %258 = vrot.lane.b32.xlu0 %v4118_v35, %s3983_s8  ;;  %264 = vrot.lane.b32.xlu1 %v4118_v35, %s3985_s10 }
 0x120   :  { %896 = vrot.lane.b32.xlu1 %v4139_v37, %s3982_s7  ;;  %890 = vrot.lane.b32.xlu0 %v4139_v37, %s3980_s30 }
 0x124   :  { %908 = vrot.lane.b32.xlu1 %v4139_v37, %s3981_s6  ;;  %902 = vrot.lane.b32.xlu0 %v4139_v37, %s3979_s1 }
 0x128   :  { %920 = vrot.lane.b32.xlu1 %v4139_v37, %s3983_s8  ;;  %914 = vrot.lane.b32.xlu0 %v4139_v37, %s3984_s9 }
 0x12c   :  { %926 = vrot.lane.b32.xlu0 %v4139_v37, %s3985_s10  ;;  %892 = vrot.lane.b32.xlu1 %v4153_v38, %s3980_s30 }
 0x130   :  { %898 = vrot.lane.b32.xlu0 %v4153_v38, %s3982_s7  ;;  %904 = vrot.lane.b32.xlu1 %v4153_v38, %s3979_s1 }
 0x134   :  { %910 = vrot.lane.b32.xlu0 %v4153_v38, %s3981_s6  ;;  %916 = vrot.lane.b32.xlu1 %v4153_v38, %s3984_s9 }
 0x138   :  { %922 = vrot.lane.b32.xlu0 %v4153_v38, %s3983_s8  ;;  %928 = vrot.lane.b32.xlu1 %v4153_v38, %s3985_s10 }
 0x15a   :  { %v571_v39 = vpop.permute.xlu1 %570  ;;  %v559_v43 = vpop.permute.xlu0 %558 }
 0x15b   :  { %v616_v52 = vcombine.low %v559_v43, %v571_v39  ;;  %v617_v11 = vcombine.high %v559_v43, %v571_v39 }
 0x15d   :  { %v624_v58 = vrot.slane %v616_v52, %v4172_v51  ;;  %v631_v25 = vrot.slane %v617_v11, %v4172_v51 }
 0x15e   :  { %v577_v46 = vpop.permute.xlu1 %576  ;;  %v565_v47 = vpop.permute.xlu0 %564 }
 0x15f   :  { %v600_v50 = vcombine.low %v4069_v18, %v565_v47  ;;  %v601_v5 = vcombine.high %v4069_v18, %v565_v47 }
 0x161   :  { %v608_v56 = vrot.slane %v600_v50, %v4172_v51  ;;  %v615_v19 = vrot.slane %v601_v5, %v4172_v51 }
 0x162   :  { %v589_v53 = vpop.permute.xlu1 %588  ;;  %v583_v54 = vpop.permute.xlu0 %582 }
 0x163   :  { %v632_v57 = vcombine.low %v577_v46, %v589_v53  ;;  %v664_v63 = vcombine.low %v608_v56, %v624_v58  ;;  %v665_v1 = vcombine.high %v608_v56, %v624_v58  ;;  %v633_v6 = vcombine.high %v577_v46, %v589_v53 }
 0x164   :  { %v680_v33 = vcombine.low %v615_v19, %v631_v25 }
 0x165   :  { %v640_v3 = vrot.slane %v632_v57, %v4172_v51  ;;  %v672_v12 = vrot.slane %v664_v63, %v4178_v62  ;;  %v4185_v13 = vrot.slane %v665_v1, %v4178_v62  ;;  %v647_v20 = vrot.slane %v633_v6, %v4172_v51 }
 0x166   :  { %v595_v59 = vpop.permute.xlu0 %594  ;;  %v4176_v60 = vpop.permute.xlu1 %226  ;;  %v4211_v52 = vrot.slane %v680_v33, %v4178_v62  ;;  %v681_v6 = vcombine.high %v615_v19, %v631_v25 }
 0x167   :  { %v648_v61 = vcombine.low %v583_v54, %v595_v59  ;;  %v649_v2 = vcombine.high %v583_v54, %v595_v59 }
 0x169   :  { %v656_v4 = vrot.slane %v648_v61, %v4172_v51  ;;  %v663_v14 = vrot.slane %v649_v2, %v4172_v51 }
 0x16a   :  { %v233_v7 = vpop.permute.xlu0 %232  ;;  %v239_v8 = vpop.permute.xlu1 %238 }
 0x16b   :  { %v696_v9 = vcombine.low %v640_v3, %v656_v4  ;;  %v697_v10 = vcombine.high %v640_v3, %v656_v4  ;;  %v268_v17 = vcombine.low %v4082_v28, %v233_v7  ;;  %v284_v18 = vcombine.low %v4176_v60, %v239_v8 }
 0x16c   :  { %v712_v26 = vcombine.low %v647_v20, %v663_v14  ;;  %v269_v34 = vcombine.high %v4082_v28, %v233_v7  ;;  %v285_v45 = vcombine.high %v4176_v60, %v239_v8  ;;  %v713_v60 = vcombine.high %v647_v20, %v663_v14 }
 0x16d   :  { %v704_v15 = vrot.slane %v696_v9, %v4178_v62  ;;  %v4190_v16 = vrot.slane %v697_v10, %v4178_v62  ;;  %v276_v27 = vrot.slane %v268_v17, %v4172_v51  ;;  %v292_v29 = vrot.slane %v284_v18, %v4172_v51 }
 0x16e   :  { %v245_v21 = vpop.permute.xlu0 %244  ;;  %v251_v22 = vpop.permute.xlu1 %250  ;;  %v4203_v44 = vrot.slane %v712_v26, %v4178_v62  ;;  %v283_v61 = vrot.slane %v269_v34, %v4172_v51  ;;  %v299_v63 = vrot.slane %v285_v45, %v4172_v51  ;;  %v4234_v14 = vrot.slane %v713_v60, %v4178_v62 }
 0x16f   :  { %v728_v23 = vcombine.low %v672_v12, %v704_v15  ;;  %v730_v24 = vcombine.low %v4185_v13, %v4190_v16  ;;  %v332_v48 = vcombine.low %v276_v27, %v292_v29  ;;  %v333_v49 = vcombine.high %v276_v27, %v292_v29 }
 0x170   :  { %v729_v55 = vcombine.high %v672_v12, %v704_v15  ;;  %v732_v1 = vcombine.low %v4211_v52, %v4203_v44  ;;  %v348_v17 = vcombine.low %v283_v61, %v299_v63 }
 0x171   :  { %v872_v30 = vpack.c.bf16 %v728_v23, %v728_v23  ;;  %v874_v32 = vpack.c.bf16 %v730_v24, %v730_v24  ;;  %v340_v2 = vrot.slane %v332_v48, %v4178_v62  ;;  %v347_v3 = vrot.slane %v333_v49, %v4178_v62 }
 0x172   :  { %v257_v36 = vpop.permute.xlu0 %256  ;;  %v263_v39 = vpop.permute.xlu1 %262  ;;  %v873_v12 = vpack.c.bf16 %v729_v55, %v729_v55  ;;  %v876_v15 = vpack.c.bf16 %v732_v1, %v732_v1  ;;  %v731_v23 = vcombine.high %v4185_v13, %v4190_v16  ;;  %v349_v16 = vcombine.high %v283_v61, %v299_v63 }
 0x173   :  { %v300_v40 = vcombine.low %v245_v21, %v257_v36  ;;  %v301_v41 = vcombine.high %v245_v21, %v257_v36  ;;  %v316_v42 = vcombine.low %v251_v22, %v263_v39  ;;  %v317_v43 = vcombine.high %v251_v22, %v263_v39 }
 0x174   :  { %v1225_v46 = vsel %vm1220_vm2, %v872_v30, 0  ;;  %v1317_v47 = vsel %vm1220_vm2, %v874_v32, 0  ;;  %v4237_v21 = vrot.slane %v681_v6, %v4178_v62  ;;  %v1271_v26 = vsel %vm1220_vm2, %v873_v12, 0 }
 0x175   :  { %v308_v50 = vrot.slane %v300_v40, %v4172_v51  ;;  %v324_v28 = vrot.slane %v316_v42, %v4172_v51  ;;  %3632 = vmatpush3.bf16.xpose.msra.mxu1 %v1225_v46  ;;  %3644 = vmatpush3.bf16.xpose.msra.mxu0 %v1317_v47  ;;  %v315_v56 = vrot.slane %v301_v41, %v4172_v51  ;;  %v1409_v29 = vsel %vm1220_vm2, %v876_v15, 0 }
 0x176   :  { %v4213_v53 = vpop.permute.xlu0 %560  ;;  %v4215_v54 = vpop.permute.xlu1 %566  ;;  %3637 = vmatprep.subr.bf16.mxu1 %v3977_v0  ;;  %v331_v57 = vrot.slane %v317_v43, %v4172_v51  ;;  %3655 = vmatprep.subr.bf16.mxu0 %v3977_v0  ;;  %v734_v13 = vcombine.low %v4237_v21, %v4234_v14  ;;  %v356_v30 = vrot.slane %v348_v17, %v4178_v62 }
 0x177   :  { %v364_v58 = vcombine.low %v308_v50, %v324_v28  ;;  %v365_v59 = vcombine.high %v308_v50, %v324_v28  ;;  %v736_v27 = vcombine.low %v4104_v31, %v4215_v54  ;;  %v875_v41 = vpack.c.bf16 %v731_v23, %v731_v23 }
 0x178   :  { %v380_v9 = vcombine.low %v315_v56, %v331_v57  ;;  %v381_v32 = vcombine.high %v315_v56, %v331_v57  ;;  %v737_v43 = vcombine.high %v4104_v31, %v4215_v54  ;;  %v878_v47 = vpack.c.bf16 %v734_v13, %v734_v13 }
 0x179   :  { %v372_v4 = vrot.slane %v364_v58, %v4178_v62  ;;  %v379_v5 = vrot.slane %v365_v59, %v4178_v62  ;;  %v4272_v45 = vrot.slane %v736_v27, %v4172_v51  ;;  %v363_v48 = vrot.slane %v349_v16, %v4178_v62 }
 0x17a   :  { %v4229_v7 = vpop.permute.xlu0 %572  ;;  %v4231_v8 = vpop.permute.xlu1 %578  ;;  %v388_v24 = vrot.slane %v380_v9, %v4178_v62  ;;  %v395_v49 = vrot.slane %v381_v32, %v4178_v62  ;;  %v733_v28 = vcombine.high %v4211_v52, %v4203_v44  ;;  %v1363_v58 = vsel %vm1220_vm2, %v875_v41, 0 }
 0x17b   :  { %v396_v10 = vcombine.low %v340_v2, %v372_v4  ;;  %v398_v11 = vcombine.low %v347_v3, %v379_v5  ;;  %v752_v25 = vcombine.low %v4213_v53, %v4229_v7  ;;  %v397_v33 = vcombine.high %v340_v2, %v372_v4 }
 0x17c   :  { %v400_v42 = vcombine.low %v356_v30, %v388_v24  ;;  %v399_v59 = vcombine.high %v347_v3, %v379_v5  ;;  %v753_v61 = vcombine.high %v4213_v53, %v4229_v7  ;;  %v4289_v44 = vcombine.high %v356_v30, %v388_v24 }
 0x17d   :  { %v540_v18 = vpack.c.bf16 %v396_v10, %v396_v10  ;;  %v542_v20 = vpack.c.bf16 %v398_v11, %v398_v11  ;;  %v4258_v34 = vrot.slane %v752_v25, %v4172_v51  ;;  %v541_v50 = vpack.c.bf16 %v397_v33, %v397_v33 }
 0x17e   :  { %v4239_v22 = vpop.permute.xlu0 %584  ;;  %v4241_v19 = vpop.permute.xlu1 %590  ;;  %v544_v60 = vpack.c.bf16 %v400_v42, %v400_v42  ;;  %v4292_v52 = vrot.slane %v737_v43, %v4172_v51  ;;  %v1501_v2 = vsel %vm1220_vm2, %v878_v47, 0  ;;  %v402_v4 = vcombine.low %v363_v48, %v395_v49 }
 0x17f   :  { %3634 = vmatmul.mubr.msk.bf16.vlgmr.msra.gmra.mrb[4].mxu1 %vm1220_vm2, %v540_v18  ;;  %3646 = vmatmul.mubr.msk.bf16.vlgmr.msra.gmra.mrb[8].mxu0 %vm1220_vm2, %v542_v20  ;;  %v768_v36 = vcombine.low %v4231_v8, %v4241_v19  ;;  %v800_v55 = vcombine.low %v4272_v45, %v4258_v34  ;;  %v769_v3 = vcombine.high %v4231_v8, %v4241_v19 }
 0x180   :  { %3638 = vmatpush3.bf16.xpose.msra.mxu1 %v1271_v26  ;;  %3656 = vmatpush3.bf16.xpose.msra.mxu0 %v1409_v29  ;;  %v4300_v6 = vcombine.high %v363_v48, %v395_v49  ;;  %v543_v15 = vpack.c.bf16 %v399_v59, %v399_v59  ;;  %v4305_v17 = vrot.slane %v753_v61, %v4172_v51 }
 0x181   :  { %3639 = vmatprep.mubr.msk.bf16.mxu1 %vm3978_vm1, %v3977_v0  ;;  %3649 = vmatprep.subr.bf16.mxu1 %v3977_v0  ;;  %v776_v31 = vrot.slane %v768_v36, %v4172_v51  ;;  %v808_v7 = vrot.slane %v800_v55, %v4178_v62  ;;  %v877_v18 = vpack.c.bf16 %v733_v28, %v733_v28 }
 0x182   :  { %v597_v39 = vpop.permute.xlu0 %596  ;;  %v4262_v40 = vpop.permute.xlu1 %228  ;;  %3657 = vmatprep.mubr.msk.bf16.mxu0 %vm3978_vm1, %v3977_v0  ;;  %3667 = vmatprep.subr.bf16.mxu0 %v3977_v0  ;;  %v801_v20 = vcombine.high %v4272_v45, %v4258_v34  ;;  %v4319_v23 = vrot.slane %v769_v3, %v4172_v51  ;;  %v735_v30 = vcombine.high %v4237_v21, %v4234_v14 }
 0x183   :  { %v784_v46 = vcombine.low %v4239_v22, %v597_v39  ;;  %v785_v63 = vcombine.high %v4239_v22, %v597_v39  ;;  %v1455_v36 = vsel %vm1220_vm2, %v877_v18, 0  ;;  %v545_v28 = vpack.c.bf16 %v4289_v44, %v4289_v44 }
 0x184   :  { %v4339_v39 = vrot.slane %v801_v20, %v4178_v62 }
 0x185   :  { %v792_v54 = vrot.slane %v784_v46, %v4172_v51  ;;  %v4308_v8 = vrot.slane %v785_v63, %v4172_v51 }
 0x186   :  { %v235_v56 = vpop.permute.xlu0 %234  ;;  %v241_v57 = vpop.permute.xlu1 %240 }
 0x187   :  { %3640 = vmatmul.mubr.msk.bf16.vlgmr.msra.gmra.mrb[8].mxu1 %vm1220_vm2, %v541_v50  ;;  %v832_v1 = vcombine.low %v776_v31, %v792_v54  ;;  %v404_v5 = vcombine.low %v4118_v35, %v235_v56  ;;  %v420_v53 = vcombine.low %v4262_v40, %v241_v57  ;;  %3658 = vmatmul.mubr.msk.bf16.vlgmr.msra.gmra.mrb[12].mxu0 %vm1220_vm2, %v544_v60 }
 0x188   :  { %3650 = vmatpush3.bf16.xpose.msra.mxu1 %v1363_v58  ;;  %v833_v9 = vcombine.high %v776_v31, %v792_v54  ;;  %3668 = vmatpush3.bf16.xpose.msra.mxu0 %v1501_v2  ;;  %v405_v22 = vcombine.high %v4118_v35, %v235_v56  ;;  %v421_v25 = vcombine.high %v4262_v40, %v241_v57 }
 0x189   :  { %v840_v10 = vrot.slane %v832_v1, %v4178_v62  ;;  %3651 = vmatprep.mubr.msk.bf16.mxu1 %vm3978_vm1, %v3977_v0  ;;  %3661 = vmatprep.subr.bf16.mxu1 %v3977_v0  ;;  %v4322_v24 = vrot.slane %v404_v5, %v4172_v51  ;;  %v4326_v26 = vrot.slane %v420_v53, %v4172_v51 }
 0x18a   :  { %v247_v11 = vpop.permute.xlu0 %246  ;;  %v253_v12 = vpop.permute.xlu1 %252  ;;  %3669 = vmatprep.mubr.msk.bf16.mxu0 %vm3978_vm1, %v3977_v0  ;;  %3679 = vmatprep.subr.bf16.mxu0 %v3977_v0  ;;  %v546_v35 = vpack.c.bf16 %v402_v4, %v402_v4  ;;  %v4330_v27 = vrot.slane %v833_v9, %v4178_v62  ;;  %v848_v32 = vcombine.low %v4319_v23, %v4308_v8 }
 0x18b   :  { %v864_v19 = vcombine.low %v808_v7, %v840_v10  ;;  %v816_v40 = vcombine.low %v4292_v52, %v4305_v17  ;;  %v4344_v41 = vrot.slane %v405_v22, %v4172_v51  ;;  %v4350_v21 = vrot.slane %v421_v25, %v4172_v51 }
 0x18c   :  { %v468_v42 = vcombine.low %v4322_v24, %v4326_v26  ;;  %v866_v48 = vcombine.low %v4339_v39, %v4330_v27  ;;  %v4363_v55 = vrot.slane %v848_v32, %v4178_v62  ;;  %v879_v54 = vpack.c.bf16 %v735_v30, %v735_v30 }
 0x18d   :  { %v880_v16 = vpack.c.bf16 %v864_v19, %v864_v19  ;;  %v817_v56 = vcombine.high %v4292_v52, %v4305_v17  ;;  %v4370_v57 = vrot.slane %v816_v40, %v4178_v62  ;;  %v849_v58 = vcombine.high %v4319_v23, %v4308_v8 }
 0x18e   :  { %v259_v29 = vpop.permute.xlu0 %258  ;;  %v265_v13 = vpop.permute.xlu1 %264  ;;  %v865_v59 = vcombine.high %v808_v7, %v840_v10  ;;  %v469_v60 = vcombine.high %v4322_v24, %v4326_v26  ;;  %v476_v61 = vrot.slane %v468_v42, %v4178_v62  ;;  %v484_v52 = vcombine.low %v4344_v41, %v4350_v21 }
 0x18f   :  { %v436_v33 = vcombine.low %v247_v11, %v259_v29  ;;  %v452_v34 = vcombine.low %v253_v12, %v265_v13  ;;  %3652 = vmatmul.mubr.msk.bf16.vlgmr.msra.gmra.mrb[12].mxu1 %vm1220_vm2, %v543_v15  ;;  %v1593_v14 = vsel %vm1220_vm2, %v880_v16, 0  ;;  %3670 = vmatmul.mubr.msk.bf16.vlgmr.msra.gmra.mrb[16].mxu0 %vm1220_vm2, %v546_v35  ;;  %v437_v46 = vcombine.high %v247_v11, %v259_v29 }
 0x190   :  { %3662 = vmatpush3.bf16.xpose.msra.mxu1 %v1455_v36  ;;  %3663 = vmatprep.mubr.msk.bf16.mxu1 %vm3978_vm1, %v3977_v0  ;;  %v453_v47 = vcombine.high %v253_v12, %v265_v13  ;;  %v882_v4 = vpack.c.bf16 %v866_v48, %v866_v48  ;;  %v1547_v7 = vsel %vm1220_vm2, %v879_v54, 0  ;;  %v868_v9 = vcombine.low %v4370_v57, %v4363_v55 }
 0x191   :  { %v444_v43 = vrot.slane %v436_v33, %v4172_v51  ;;  %v460_v45 = vrot.slane %v452_v34, %v4172_v51  ;;  %3680 = vmatpush3.bf16.xpose.msra.mxu0 %v1593_v14  ;;  %3673 = vmatprep.subr.bf16.mxu1 %v3977_v0  ;;  %v4382_v1 = vrot.slane %v437_v46, %v4172_v51 }
 0x192   :  { %v897_v49 = vpop.permute.xlu1 %896  ;;  %v891_v50 = vpop.permute.xlu0 %890  ;;  %3681 = vmatprep.mubr.msk.bf16.mxu0 %vm3978_vm1, %v3977_v0  ;;  %3691 = vmatprep.subr.bf16.mxu0 %v3977_v0  ;;  %v4385_v2 = vrot.slane %v453_v47, %v4172_v51  ;;  %v547_v10 = vpack.c.bf16 %v4300_v6, %v4300_v6  ;;  %v881_v11 = vpack.c.bf16 %v865_v59, %v865_v59  ;;  %v1685_v22 = vsel %vm1220_vm2, %v882_v4, 0 }
 0x193   :  { %v500_v31 = vcombine.low %v444_v43, %v460_v45  ;;  %v501_v63 = vcombine.high %v444_v43, %v460_v45  ;;  %v4394_v12 = vrot.slane %v817_v56, %v4178_v62  ;;  %v4397_v15 = vrot.slane %v849_v58, %v4178_v62 }
 0x194   :  { %v4405_v18 = vrot.slane %v469_v60, %v4178_v62  ;;  %v4408_v6 = vrot.slane %v484_v52, %v4178_v62  ;;  %v516_v20 = vcombine.low %v4382_v1, %v4385_v2  ;;  %v884_v23 = vpack.c.bf16 %v868_v9, %v868_v9 }
 0x195   :  { %v508_v44 = vrot.slane %v500_v31, %v4178_v62  ;;  %v4400_v17 = vrot.slane %v501_v63, %v4178_v62  ;;  %v932_v24 = vcombine.low %v4139_v37, %v897_v49  ;;  %v933_v25 = vcombine.high %v4139_v37, %v897_v49 }
 0x196   :  { %v909_v3 = vpop.permute.xlu1 %908  ;;  %v903_v5 = vpop.permute.xlu0 %902  ;;  %v1639_v29 = vsel %vm1220_vm2, %v881_v11, 0  ;;  %v4429_v36 = vrot.slane %v516_v20, %v4178_v62  ;;  %v867_v40 = vcombine.high %v4339_v39, %v4330_v27  ;;  %v1777_v56 = vsel %vm1220_vm2, %v884_v23, 0 }
 0x197   :  { %v532_v53 = vcombine.low %v476_v61, %v508_v44  ;;  %3664 = vmatmul.mubr.msk.bf16.vlgmr.msra.gmra.mrb[16].mxu1 %vm1220_vm2, %v545_v28  ;;  %v948_v26 = vcombine.low %v891_v50, %v903_v5  ;;  %v949_v13 = vcombine.high %v891_v50, %v903_v5  ;;  %v534_v32 = vcombine.low %v4405_v18, %v4400_v17 }
 0x198   :  { %3674 = vmatpush3.bf16.xpose.msra.mxu1 %v1547_v7  ;;  %3675 = vmatprep.mubr.msk.bf16.mxu1 %vm3978_vm1, %v3977_v0  ;;  %v940_v33 = vrot.slane %v932_v24, %v4172_v51  ;;  %v4425_v37 = vrot.slane %v933_v25, %v4172_v51  ;;  %v533_v49 = vcombine.high %v476_v61, %v508_v44 }
 0x199   :  { %v548_v8 = vpack.c.bf16 %v532_v53, %v532_v53  ;;  %3685 = vmatprep.subr.bf16.mxu1 %v3977_v0  ;;  %v956_v34 = vrot.slane %v948_v26, %v4172_v51  ;;  %v963_v14 = vrot.slane %v949_v13, %v4172_v51  ;;  %v550_v39 = vpack.c.bf16 %v534_v32, %v534_v32 }
 0x19a   :  { %v915_v19 = vpop.permute.xlu0 %914  ;;  %v921_v35 = vpop.permute.xlu1 %920  ;;  %v883_v58 = vpack.c.bf16 %v867_v40, %v867_v40  ;;  %v870_v59 = vcombine.low %v4394_v12, %v4397_v15  ;;  %v517_v4 = vcombine.high %v4382_v1, %v4385_v2  ;;  %v549_v5 = vpack.c.bf16 %v533_v49, %v533_v49 }
 0x19b   :  { %3682 = vmatmul.mubr.msk.bf16.vlgmr.msra.gmra.mrb[20].mxu0 %vm1220_vm2, %v548_v8  ;;  %v964_v16 = vcombine.low %v909_v3, %v921_v35  ;;  %v965_v30 = vcombine.high %v909_v3, %v921_v35  ;;  %v997_v45 = vcombine.high %v940_v33, %v956_v34  ;;  %v1012_v50 = vcombine.low %v4425_v37, %v963_v14 }
 0x19c   :  { %3692 = vmatpush3.bf16.xpose.msra.mxu0 %v1685_v22  ;;  %3693 = vmatprep.mubr.msk.bf16.mxu0 %vm3978_vm1, %v3977_v0  ;;  %v1013_v27 = vcombine.high %v4425_v37, %v963_v14  ;;  %v996_v28 = vcombine.low %v940_v33, %v956_v34  ;;  %v536_v3 = vcombine.low %v4408_v6, %v4429_v36  ;;  %v1731_v2 = vsel %vm1220_vm2, %v883_v58, 0 }
 0x19d   :  { %3703 = vmatprep.subr.bf16.mxu0 %v3977_v0  ;;  %v972_v42 = vrot.slane %v964_v16, %v4172_v51  ;;  %v979_v46 = vrot.slane %v965_v30, %v4172_v51  ;;  %v1011_v60 = vrot.slane %v997_v45, %v4178_v62  ;;  %v869_v1 = vcombine.high %v4370_v57, %v4363_v55 }
 0x19e   :  { %v927_v43 = vpop.permute.xlu0 %926  ;;  %v1004_v53 = vrot.slane %v996_v28, %v4178_v62  ;;  %v886_v11 = vpack.c.bf16 %v870_v59, %v870_v59  ;;  %v531_v22 = vrot.slane %v517_v4, %v4178_v62  ;;  %v1020_v55 = vrot.slane %v1012_v50, %v4178_v62 }
 0x19f   :  { %3676 = vmatmul.mubr.msk.bf16.vlgmr.msra.gmra.mrb[20].mxu1 %vm1220_vm2, %v547_v10  ;;  %v980_v47 = vcombine.low %v915_v19, %v927_v43  ;;  %v981_v48 = vcombine.high %v915_v19, %v927_v43  ;;  %v485_v10 = vcombine.high %v4344_v41, %v4350_v21  ;;  %v535_v19 = vcombine.high %v4405_v18, %v4400_v17 }
 0x1a0   :  { %3686 = vmatpush3.bf16.xpose.msra.mxu1 %v1639_v29  ;;  %3687 = vmatprep.mubr.msk.bf16.mxu1 %vm3978_vm1, %v3977_v0  ;;  %v552_v41 = vpack.c.bf16 %v536_v3, %v536_v3  ;;  %v1869_v26 = vsel %vm1220_vm2, %v886_v11, 0  ;;  %v885_v35 = vpack.c.bf16 %v869_v1, %v869_v1  ;;  %v1027_v17 = vrot.slane %v1013_v27, %v4178_v62 }
 0x1a1   :  { %3697 = vmatprep.subr.bf16.mxu1 %v3977_v0  ;;  %v988_v31 = vrot.slane %v980_v47, %v4172_v51  ;;  %v995_v54 = vrot.slane %v981_v48, %v4172_v51  ;;  %v499_v25 = vrot.slane %v485_v10, %v4178_v62  ;;  %v551_v13 = vpack.c.bf16 %v535_v19, %v535_v19 }
 0x1a2   :  { %v1823_v34 = vsel %vm1220_vm2, %v885_v35, 0  ;;  %v871_v40 = vcombine.high %v4394_v12, %v4397_v15  ;;  %v537_v45 = vcombine.high %v4408_v6, %v4429_v36 }
 0x1a3   :  { %3694 = vmatmul.mubr.msk.bf16.vlgmr.msra.gmra.mrb[24].mxu0 %vm1220_vm2, %v550_v39  ;;  %v1028_v61 = vcombine.low %v972_v42, %v988_v31  ;;  %v1029_v63 = vcombine.high %v972_v42, %v988_v31  ;;  %v1044_v44 = vcombine.low %v979_v46, %v995_v54  ;;  %v1045_v52 = vcombine.high %v979_v46, %v995_v54 }
 0x1a4   :  { %3704 = vmatpush3.bf16.xpose.msra.mxu0 %v1777_v56  ;;  %3705 = vmatprep.mubr.msk.bf16.mxu0 %vm3978_vm1, %v3977_v0  ;;  %v538_v29 = vcombine.low %v499_v25, %v531_v22  ;;  %v887_v50 = vpack.c.bf16 %v871_v40, %v871_v40  ;;  %v553_v27 = vpack.c.bf16 %v537_v45, %v537_v45 }
 0x1a5   :  { %3715 = vmatprep.subr.bf16.mxu0 %v3977_v0  ;;  %v1036_v7 = vrot.slane %v1028_v61, %v4178_v62  ;;  %v1043_v9 = vrot.slane %v1029_v63, %v4178_v62  ;;  %v1052_v57 = vrot.slane %v1044_v44, %v4178_v62  ;;  %v1059_v18 = vrot.slane %v1045_v52, %v4178_v62 }
 0x1a6   :  { %v554_v46 = vpack.c.bf16 %v538_v29, %v538_v29  ;;  %v1915_v31 = vsel %vm1220_vm2, %v887_v50, 0  ;;  %v539_v54 = vcombine.high %v499_v25, %v531_v22 }
 0x1a7   :  { %3688 = vmatmul.mubr.msk.bf16.vlgmr.msra.gmra.mrb[24].mxu1 %vm1220_vm2, %v549_v5  ;;  %v1062_v8 = vcombine.low %v1011_v60, %v1043_v9  ;;  %v1063_v20 = vcombine.high %v1011_v60, %v1043_v9  ;;  %v1060_v21 = vcombine.low %v1004_v53, %v1036_v7  ;;  %v1064_v33 = vcombine.low %v1020_v55, %v1052_v57 }
 0x1a8   :  { %3698 = vmatpush3.bf16.xpose.msra.mxu1 %v1731_v2  ;;  %3699 = vmatprep.mubr.msk.bf16.mxu1 %vm3978_vm1, %v3977_v0  ;;  %v1065_v37 = vcombine.high %v1020_v55, %v1052_v57  ;;  %v1066_v43 = vcombine.low %v1027_v17, %v1059_v18  ;;  %v1067_v49 = vcombine.high %v1027_v17, %v1059_v18 }
 0x1a9   :  { %3709 = vmatprep.subr.bf16.mxu1 %v3977_v0  ;;  %v1206_v23 = vpack.c.bf16 %v1062_v8, %v1062_v8  ;;  %v1207_v24 = vpack.c.bf16 %v1063_v20, %v1063_v20  ;;  %v1204_v16 = vpack.c.bf16 %v1060_v21, %v1060_v21  ;;  %v1208_v14 = vpack.c.bf16 %v1064_v33, %v1064_v33 }
 0x1aa   :  { %v1209_v42 = vpack.c.bf16 %v1065_v37, %v1065_v37  ;;  %v1210_v15 = vpack.c.bf16 %v1066_v43, %v1066_v43  ;;  %v1211_v36 = vpack.c.bf16 %v1067_v49, %v1067_v49  ;;  %v1061_v39 = vcombine.high %v1004_v53, %v1036_v7 }
 0x1ab   :  { %3706 = vmatmul.mubr.msk.bf16.vlgmr.msra.gmra.mrb[28].mxu0 %vm1220_vm2, %v552_v41  ;;  %v4482_v30 = vsel %vm2281_vm3, %v1206_v23, 0  ;;  %v4485_v32 = vsel %vm2281_vm3, %v1207_v24, 0  ;;  %v2283_v47 = vsel %vm2281_vm3, %v1204_v16, 0  ;;  %v4498_v48 = vsel %vm2281_vm3, %v1208_v14, 0 }
 0x1ac   :  { %3716 = vmatpush3.bf16.xpose.msra.mxu0 %v1869_v26  ;;  %3717 = vmatprep.mubr.msk.bf16.mxu0 %vm3978_vm1, %v3977_v0  ;;  %v4501_v12 = vsel %vm2281_vm3, %v1209_v42, 0  ;;  %v4507_v6 = vsel %vm2281_vm3, %v1210_v15, 0  ;;  %v4511_v28 = vsel %vm2281_vm3, %v1211_v36, 0  ;;  %v1205_v56 = vpack.c.bf16 %v1061_v39, %v1061_v39 }
 0x1ad   :  { %3727 = vmatprep.subr.bf16.mxu0 %v3977_v0  ;;  %v555_v58 = vpack.c.bf16 %v539_v54, %v539_v54 }
 0x1ae   :  { %v2329_v59 = vsel %vm2281_vm3, %v1205_v56, 0 }
 0x1af   :  { %3700 = vmatmul.mubr.msk.bf16.vlgmr.msra.gmra.mrb[28].mxu1 %vm1220_vm2, %v551_v13 }
 0x1b0   :  { %3710 = vmatpush3.bf16.xpose.msra.mxu1 %v1823_v34  ;;  %3711 = vmatprep.mubr.msk.bf16.mxu1 %vm3978_vm1, %v3977_v0 }
 0x1b1   :  { %3721 = vmatprep.subr.bf16.mxu1 %v3977_v0 }
 0x1b3   :  { %3718 = vmatmul.mubr.msk.bf16.vlgmr.msra.gmra.mrb[32].mxu0 %vm1220_vm2, %v554_v46 }
 0x1b4   :  { %3728 = vmatpush3.bf16.msra.mxu0 %v2283_v47  ;;  %3729 = vmatprep.mubr.msk.bf16.mxu0 %vm3978_vm1, %v3977_v0 }
 0x1b5   :  { %3739 = vmatprep.subr.bf16.mxu0 %v3977_v0 }
 0x1b7   :  { %3712 = vmatmul.mubr.msk.bf16.vlgmr.msra.gmra.mrb[32].mxu1 %vm1220_vm2, %v553_v27 }
 0x1b8   :  { %3722 = vmatpush3.bf16.xpose.msra.mxu1 %v1915_v31  ;;  %3723 = vmatprep.mubr.msk.bf16.mxu1 %vm3978_vm1, %v3977_v0 }
 0x1b9   :  { %3733 = vmatprep.subr.bf16.mxu1 %v3977_v0 }
 0x1bf   :  { %3724 = vmatmul.mubr.msk.bf16.vlgmr.msra.gmra.mrb[36].mxu1 %vm1220_vm2, %v555_v58 }
 0x1c0   :  { %3734 = vmatpush3.bf16.msra.mxu1 %v2329_v59  ;;  %3735 = vmatprep.mubr.msk.bf16.mxu1 %vm3978_vm1, %v3977_v0 }
 0x1c1   :  { %3745 = vmatprep.subr.bf16.mxu1 %v3977_v0 }
 0x252   :  { %v1261_v60 = vpop.f32.mrb[4].mxu1  ;;  %v1353_v63 = vpop.f32.mrb[8].mxu0 }
 0x253   :  { %v1958_v61 = vsel %vm1957_vm4, %v1261_v60, -inf  ;;  %v3635_v44 = vpop.f32.mrb[5].mxu1  ;;  %v1972_v4 = vsel %vm1957_vm4, %v1353_v63, -inf  ;;  %v3647_v3 = vpop.f32.mrb[9].mxu0 }
 0x254   :  { %v1959_v52 = vrot.slane %v1958_v61, 4  ;;  %v1264_v5 = vpop.f32.mrb[6].mxu1  ;;  %v1973_v53 = vrot.slane %v1972_v4, 4  ;;  %v1356_v7 = vpop.f32.mrb[10].mxu0 }
 0x255   :  { %v3636_v9 = vpop.f32.mrb[7].mxu1  ;;  %v3648_v1 = vpop.f32.mrb[11].mxu0 }
 0x256   :  { %v1960_v10 = vmax.f32 %v1958_v61, %v1959_v52  ;;  %v1974_v2 = vmax.f32 %v1972_v4, %v1973_v53  ;;  %v899_v3 = vpop.permute.xlu0 %898 }
 0x258   :  { %v1961_v11 = vrot.slane %v1960_v10, 2  ;;  %v1975_v8 = vrot.slane %v1974_v2, 2 }
 0x25a   :  { %v1962_v20 = vmax.f32 %v1960_v10, %v1961_v11  ;;  %v1307_v22 = vpop.f32.mrb[8].mxu1  ;;  %v1976_v19 = vmax.f32 %v1974_v2, %v1975_v8  ;;  %v1445_v23 = vpop.f32.mrb[12].mxu0 }
 0x25b   :  { %v1965_v41 = vsel %vm1957_vm4, %v1307_v22, -inf  ;;  %v3641_v21 = vpop.f32.mrb[9].mxu1  ;;  %v1986_v26 = vsel %vm1957_vm4, %v1445_v23, -inf  ;;  %v3659_v35 = vpop.f32.mrb[13].mxu0 }
 0x25c   :  { %v1963_v55 = vrot.slane %v1962_v20, 1  ;;  %v1966_v57 = vrot.slane %v1965_v41, 4  ;;  %v1310_v24 = vpop.f32.mrb[10].mxu1  ;;  %v1977_v25 = vrot.slane %v1976_v19, 1  ;;  %v1987_v13 = vrot.slane %v1986_v26, 4  ;;  %v1448_v16 = vpop.f32.mrb[14].mxu0 }
 0x25d   :  { %v3642_v17 = vpop.f32.mrb[11].mxu1  ;;  %v3660_v37 = vpop.f32.mrb[15].mxu0 }
 0x25e   :  { %v1964_v18 = vmax.f32 %v1962_v20, %v1963_v55  ;;  %v1967_v29 = vmax.f32 %v1965_v41, %v1966_v57  ;;  %v1978_v33 = vmax.f32 %v1976_v19, %v1977_v25  ;;  %v1988_v14 = vmax.f32 %v1986_v26, %v1987_v13 }
 0x25f   :  { %v1068_v19 = vcombine.low %v4153_v38, %v899_v3  ;;  %v1069_v26 = vcombine.high %v4153_v38, %v899_v3 }
 0x260   :  { %v2070_v34 = vsub.f32 %v1261_v60, %v1964_v18  ;;  %v1968_v40 = vrot.slane %v1967_v29, 2  ;;  %v2072_v42 = vsub.f32 %v1353_v63, %v1978_v33  ;;  %v1989_v46 = vrot.slane %v1988_v14, 2  ;;  %v4535_v60 = vpop.permute.xlu1 %892 }
 0x262   :  { %v2086_v43 = vmul.f32 1.442695, %v2070_v34  ;;  %v1969_v45 = vmax.f32 %v1967_v29, %v1968_v40  ;;  %v4527_v47 = vpop.f32.mrb[12].mxu1  ;;  %v2090_v15 = vmul.f32 1.442695, %v2072_v42  ;;  %v1990_v27 = vmax.f32 %v1988_v14, %v1989_v46  ;;  %v4531_v31 = vpop.f32.mrb[16].mxu0 }
 0x263   :  { %v1979_v49 = vsel %vm1957_vm4, %v4527_v47, -inf  ;;  %v3653_v50 = vpop.f32.mrb[13].mxu1  ;;  %v2000_v56 = vsel %vm1957_vm4, %v4531_v31, -inf  ;;  %v3671_v58 = vpop.f32.mrb[17].mxu0  ;;  %v4556_v34 = vrot.slane %v1068_v19, %v4172_v51 }
 0x264   :  { %3847 = vpow2.f32 %v2086_v43  ;;  %v1970_v36 = vrot.slane %v1969_v45, 1  ;;  %v1980_v39 = vrot.slane %v1979_v49, 4  ;;  %v1402_v54 = vpop.f32.mrb[14].mxu1  ;;  %v1991_v63 = vrot.slane %v1990_v27, 1  ;;  %v1540_v4 = vpop.f32.mrb[18].mxu0 }
 0x265   :  { %3849 = vpow2.f32 %v2090_v15  ;;  %v3654_v59 = vpop.f32.mrb[15].mxu1  ;;  %v2001_v52 = vrot.slane %v2000_v56, 4  ;;  %v3672_v5 = vpop.f32.mrb[19].mxu0  ;;  %v4566_v50 = vrot.slane %v1069_v26, %v4172_v51 }
 0x266   :  { %v1971_v61 = vmax.f32 %v1969_v45, %v1970_v36  ;;  %v1981_v44 = vmax.f32 %v1979_v49, %v1980_v39  ;;  %v1992_v7 = vmax.f32 %v1990_v27, %v1991_v63  ;;  %v4542_v55 = vpop.permute.xlu1 %904 }
 0x267   :  { %v2002_v10 = vmax.f32 %v2000_v56, %v2001_v52  ;;  %v1084_v29 = vcombine.low %v4535_v60, %v4542_v55  ;;  %v1085_v56 = vcombine.high %v4535_v60, %v4542_v55 }
 0x268   :  { %v2071_v53 = vsub.f32 %v1307_v22, %v1971_v61  ;;  %v1982_v9 = vrot.slane %v1981_v44, 2  ;;  %v2074_v2 = vsub.f32 %v1445_v23, %v1992_v7  ;;  %v4545_v23 = vpop.permute.xlu0 %910 }
 0x269   :  { %v2003_v8 = vrot.slane %v2002_v10, 2 }
 0x26a   :  { %v2088_v1 = vmul.f32 1.442695, %v2071_v53  ;;  %v1983_v11 = vmax.f32 %v1981_v44, %v1982_v9  ;;  %v4537_v20 = vpop.f32.mrb[16].mxu1  ;;  %v2094_v57 = vmul.f32 1.442695, %v2074_v2  ;;  %v4570_v58 = vpop.permute.xlu1 %916  ;;  %v4580_v2 = vrot.slane %v1084_v29, %v4172_v51 }
 0x26b   :  { %v1993_v41 = vsel %vm1957_vm4, %v4537_v20, -inf  ;;  %v3665_v21 = vpop.f32.mrb[17].mxu1  ;;  %v2004_v24 = vmax.f32 %v2002_v10, %v2003_v8 }
 0x26c   :  { %3851 = vpow2.f32 %v2088_v1  ;;  %v1984_v22 = vrot.slane %v1983_v11, 1  ;;  %v1494_v25 = vpop.f32.mrb[18].mxu1  ;;  %v1994_v35 = vrot.slane %v1993_v41, 4 }
 0x26d   :  { %v3666_v17 = vpop.f32.mrb[19].mxu1  ;;  %3853 = vpow2.f32 %v2094_v57  ;;  %v2005_v16 = vrot.slane %v2004_v24, 1 }
 0x26e   :  { %v4547_v18 = vpop.eup %3847  ;;  %v1985_v13 = vmax.f32 %v1983_v11, %v1984_v22  ;;  %v4551_v33 = vpop.f32.mrb[20].mxu0  ;;  %v1995_v40 = vmax.f32 %v1993_v41, %v1994_v35 }
 0x26f   :  { %v4553_v37 = vpop.eup %3849  ;;  %v2118_v38 = vsel %vm1957_vm4, %v4547_v18, 0.0  ;;  %v2014_v14 = vsel %vm1957_vm4, %v4551_v33, -inf  ;;  %v3683_v42 = vpop.f32.mrb[21].mxu0  ;;  %v2006_v15 = vmax.f32 %v2004_v24, %v2005_v16 }
 0x270   :  { %v2119_v43 = vrot.slane %v2118_v38, 4  ;;  %v2132_v45 = vsel %vm1957_vm4, %v4553_v37, 0.0  ;;  %v2073_v46 = vsub.f32 %v4527_v47, %v1985_v13  ;;  %v1632_v49 = vpop.f32.mrb[22].mxu0  ;;  %v1996_v27 = vrot.slane %v1995_v40, 2  ;;  %v4575_v47 = vpop.permute.xlu0 %922 }
 0x271   :  { %v2133_v36 = vrot.slane %v2132_v45, 4  ;;  %v2015_v39 = vrot.slane %v2014_v14, 4  ;;  %v3684_v54 = vpop.f32.mrb[23].mxu0  ;;  %v2076_v63 = vsub.f32 %v4531_v31, %v2006_v15  ;;  %v1100_v21 = vcombine.low %v4545_v23, %v4575_v47  ;;  %v4592_v16 = vpop.permute.xlu1 %928 }
 0x272   :  { %v2120_v59 = vadd.f32 %v2119_v43, %v2118_v38  ;;  %v2092_v61 = vmul.f32 1.442695, %v2073_v46  ;;  %v4573_v44 = vpop.f32.mrb[20].mxu1  ;;  %v1997_v4 = vmax.f32 %v1995_v40, %v1996_v27 }
 0x273   :  { %v2134_v52 = vadd.f32 %v2133_v36, %v2132_v45  ;;  %v2016_v3 = vmax.f32 %v2014_v14, %v2015_v39  ;;  %v2007_v5 = vsel %vm1957_vm4, %v4573_v44, -inf  ;;  %v3677_v53 = vpop.f32.mrb[21].mxu1  ;;  %v2098_v9 = vmul.f32 1.442695, %v2076_v63 }
 0x274   :  { %v2121_v7 = vrot.slane %v2120_v59, 2  ;;  %3855 = vpow2.f32 %v2092_v61  ;;  %v2008_v10 = vrot.slane %v2007_v5, 4  ;;  %v1586_v1 = vpop.f32.mrb[22].mxu1  ;;  %v1998_v11 = vrot.slane %v1997_v4, 1 }
 0x275   :  { %v2135_v31 = vrot.slane %v2134_v52, 2  ;;  %v2017_v8 = vrot.slane %v2016_v3, 2  ;;  %v3678_v19 = vpop.f32.mrb[23].mxu1  ;;  %3857 = vpow2.f32 %v2098_v9  ;;  %v1116_v63 = vcombine.low %v4570_v58, %v4592_v16 }
 0x276   :  { %v4582_v41 = vpop.eup %3851  ;;  %v2122_v57 = vadd.f32 %v2121_v7, %v2120_v59  ;;  %v2009_v22 = vmax.f32 %v2007_v5, %v2008_v10  ;;  %v4586_v24 = vpop.f32.mrb[24].mxu0  ;;  %v1999_v35 = vmax.f32 %v1997_v4, %v1998_v11 }
 0x277   :  { %v2136_v25 = vadd.f32 %v2135_v31, %v2134_v52  ;;  %v2125_v26 = vsel %vm1957_vm4, %v4582_v41, 0.0  ;;  %v2018_v17 = vmax.f32 %v2016_v3, %v2017_v8  ;;  %v3695_v29 = vpop.f32.mrb[25].mxu0  ;;  %v4590_v13 = vpop.eup %3853  ;;  %v2028_v42 = vsel %vm1957_vm4, %v4586_v24, -inf }
 0x278   :  { %v2123_v38 = vrot.slane %v2122_v57, 1  ;;  %v2126_v40 = vrot.slane %v2125_v26, 4  ;;  %v2010_v14 = vrot.slane %v2009_v22, 2  ;;  %v1724_v43 = vpop.f32.mrb[26].mxu0  ;;  %v2146_v46 = vsel %vm1957_vm4, %v4590_v13, 0.0 }
 0x279   :  { %v2137_v45 = vrot.slane %v2136_v25, 1  ;;  %v2075_v15 = vsub.f32 %v4537_v20, %v1999_v35  ;;  %v2019_v49 = vrot.slane %v2018_v17, 1  ;;  %v3696_v36 = vpop.f32.mrb[27].mxu0  ;;  %v2147_v54 = vrot.slane %v2146_v46, 4 }
 0x27a   :  { %v2124_v27 = vadd.f32 %v2123_v38, %v2122_v57  ;;  %v2127_v39 = vadd.f32 %v2126_v40, %v2125_v26  ;;  %v2011_v59 = vmax.f32 %v2009_v22, %v2010_v14  ;;  %v4599_v61 = vpop.f32.mrb[24].mxu1  ;;  %v2029_v3 = vrot.slane %v2028_v42, 4 }
 0x27b   :  { %v2096_v52 = vmul.f32 1.442695, %v2075_v15  ;;  %v2020_v4 = vmax.f32 %v2018_v17, %v2019_v49  ;;  %v3689_v5 = vpop.f32.mrb[25].mxu1  ;;  %v2138_v53 = vadd.f32 %v2137_v45, %v2136_v25  ;;  %v2148_v9 = vadd.f32 %v2147_v54, %v2146_v46 }
 0x27c   :  { %v2128_v7 = vrot.slane %v2127_v39, 2  ;;  %v2012_v10 = vrot.slane %v2011_v59, 1  ;;  %v1678_v20 = vpop.f32.mrb[26].mxu1  ;;  %3859 = vrcp.f32 %v2124_v27  ;;  %v2030_v31 = vmax.f32 %v2028_v42, %v2029_v3 }
 0x27d   :  { %v2078_v1 = vsub.f32 %v4551_v33, %v2020_v4  ;;  %v2021_v11 = vsel %vm1957_vm4, %v4599_v61, -inf  ;;  %v3690_v8 = vpop.f32.mrb[27].mxu1  ;;  %v2149_v22 = vrot.slane %v2148_v9, 2  ;;  %3861 = vpow2.f32 %v2096_v52 }
 0x27e   :  { %v4606_v19 = vpop.eup %3855  ;;  %v2129_v57 = vadd.f32 %v2128_v7, %v2127_v39  ;;  %v2013_v26 = vmax.f32 %v2011_v59, %v2012_v10  ;;  %v4608_v35 = vpop.f32.mrb[28].mxu0  ;;  %v2031_v29 = vrot.slane %v2030_v31, 2  ;;  %v2022_v38 = vrot.slane %v2021_v11, 4 }
 0x27f   :  { %v2139_v25 = vsel %vm1957_vm4, %v4606_v19, 0.0  ;;  %v2102_v17 = vmul.f32 1.442695, %v2078_v1  ;;  %v3707_v33 = vpop.f32.mrb[29].mxu0  ;;  %v4612_v40 = vpop.eup %3857  ;;  %v2150_v42 = vadd.f32 %v2149_v22, %v2148_v9  ;;  %v4621_v39 = vrot.slane %v1100_v21, %v4172_v51 }
 0x280   :  { %v2130_v14 = vrot.slane %v2129_v57, 1  ;;  %v2140_v43 = vrot.slane %v2139_v25, 4  ;;  %v2077_v45 = vsub.f32 %v4573_v44, %v2013_v26  ;;  %v1816_v46 = vpop.f32.mrb[30].mxu0  ;;  %v2160_v15 = vsel %vm1957_vm4, %v4612_v40, 0.0 }
 0x281   :  { %3863 = vpow2.f32 %v2102_v17  ;;  %v2032_v49 = vmax.f32 %v2030_v31, %v2031_v29  ;;  %v2023_v36 = vmax.f32 %v2021_v11, %v2022_v38  ;;  %v3708_v27 = vpop.f32.mrb[31].mxu0  ;;  %v2151_v54 = vrot.slane %v2150_v42, 1 }
 0x282   :  { %v2141_v59 = vadd.f32 %v2140_v43, %v2139_v25  ;;  %v2161_v52 = vrot.slane %v2160_v15, 4  ;;  %v4623_v4 = vpop.f32.mrb[28].mxu1  ;;  %v2100_v44 = vmul.f32 1.442695, %v2077_v45  ;;  %v2042_v7 = vsel %vm1957_vm4, %v4608_v35, -inf }
 0x283   :  { %v2033_v3 = vrot.slane %v2032_v49, 1  ;;  %v2024_v5 = vrot.slane %v2023_v36, 2  ;;  %v3701_v9 = vpop.f32.mrb[29].mxu1  ;;  %3865 = vrcp.f32 %v2138_v53  ;;  %v2131_v10 = vadd.f32 %v2130_v14, %v2129_v57 }
 0x284   :  { %v2142_v20 = vrot.slane %v2141_v59, 2  ;;  %v2162_v1 = vadd.f32 %v2161_v52, %v2160_v15  ;;  %v1770_v31 = vpop.f32.mrb[30].mxu1  ;;  %3867 = vpow2.f32 %v2100_v44  ;;  %v2043_v8 = vrot.slane %v2042_v7, 4 }
 0x285   :  { %v2034_v21 = vmax.f32 %v2032_v49, %v2033_v3  ;;  %v2025_v11 = vmax.f32 %v2023_v36, %v2024_v5  ;;  %v3702_v22 = vpop.f32.mrb[31].mxu1  ;;  %v2152_v26 = vadd.f32 %v2151_v54, %v2150_v42  ;;  %v2035_v29 = vsel %vm1957_vm4, %v4623_v4, -inf }
 0x286   :  { %v2143_v25 = vadd.f32 %v2142_v20, %v2141_v59  ;;  %v2163_v17 = vrot.slane %v2162_v1, 2  ;;  %v4629_v38 = vpop.f32.mrb[32].mxu0  ;;  %v3860_v33 = vpop.eup %3859  ;;  %v2044_v14 = vmax.f32 %v2042_v7, %v2043_v8  ;;  %v2036_v43 = vrot.slane %v2035_v29, 4 }
 0x287   :  { %v2080_v53 = vsub.f32 %v4586_v24, %v2034_v21  ;;  %v2026_v57 = vrot.slane %v2025_v11, 1  ;;  %v3719_v45 = vpop.f32.mrb[33].mxu0  ;;  %v4632_v46 = vpop.eup %3861  ;;  %3869 = vrcp.f32 %v2131_v10  ;;  %v2056_v42 = vsel %vm1957_vm4, %v4629_v38, -inf }
 0x288   :  { %v2144_v15 = vrot.slane %v2143_v25, 1  ;;  %v4634_v49 = vadd.f32 %v2163_v17, %v2162_v1  ;;  %v1908_v36 = vpop.f32.mrb[34].mxu0  ;;  %v2153_v27 = vsel %vm1957_vm4, %v4632_v46, 0.0  ;;  %v2045_v24 = vrot.slane %v2044_v14, 2 }
 0x289   :  { %v2106_v54 = vmul.f32 1.442695, %v2080_v53  ;;  %v2027_v59 = vmax.f32 %v2025_v11, %v2026_v57  ;;  %v3720_v52 = vpop.f32.mrb[35].mxu0  ;;  %3871 = vrcp.f32 %v2152_v26  ;;  %v2154_v3 = vrot.slane %v2153_v27, 4 }
 0x28a   :  { %v2145_v44 = vadd.f32 %v2144_v15, %v2143_v25  ;;  %v2037_v5 = vmax.f32 %v2035_v29, %v2036_v43  ;;  %v4640_v7 = vpop.f32.mrb[32].mxu1  ;;  %v2046_v20 = vmax.f32 %v2044_v14, %v2045_v24  ;;  %v2057_v1 = vrot.slane %v2056_v42, 4 }
 0x28b   :  { %v4642_v9 = vpop.eup %3863  ;;  %3873 = vpow2.f32 %v2106_v54  ;;  %v2079_v10 = vsub.f32 %v4599_v61, %v2027_v59  ;;  %v3713_v31 = vpop.f32.mrb[33].mxu1  ;;  %v2165_v21 = vrot.slane %v4634_v49, 1  ;;  %v2155_v8 = vadd.f32 %v2154_v3, %v2153_v27 }
 0x28c   :  { %v2174_v11 = vsel %vm1957_vm4, %v4642_v9, 0.0  ;;  %v2246_v22 = vmul.f32 %v3860_v33, %v4547_v18  ;;  %v1862_v26 = vpop.f32.mrb[34].mxu1  ;;  %v2047_v29 = vrot.slane %v2046_v20, 1  ;;  %v2038_v53 = vrot.slane %v2037_v5, 2 }
 0x28d   :  { %v2175_v25 = vrot.slane %v2174_v11, 4  ;;  %v2104_v17 = vmul.f32 1.442695, %v2079_v10  ;;  %v3714_v57 = vpop.f32.mrb[35].mxu1  ;;  %v3866_v43 = vpop.eup %3865  ;;  %3875 = vrcp.f32 %v2145_v44  ;;  %v2156_v61 = vrot.slane %v2155_v8, 2 }
 0x28e   :  { %v2058_v14 = vmax.f32 %v2056_v42, %v2057_v1  ;;  %v2049_v45 = vsel %vm1957_vm4, %v4640_v7, -inf  ;;  %v4651_v15 = vpop.eup %3867  ;;  %v2048_v27 = vmax.f32 %v2046_v20, %v2047_v29  ;;  %v2039_v54 = vmax.f32 %v2037_v5, %v2038_v53 }
 0x28f   :  { %v2176_v36 = vadd.f32 %v2175_v25, %v2174_v11  ;;  %3877 = vpow2.f32 %v2104_v17  ;;  %v2157_v18 = vadd.f32 %v2156_v61, %v2155_v8  ;;  %v2167_v33 = vsel %vm1957_vm4, %v4651_v15, 0.0 }
 0x290   :  { %v2059_v59 = vrot.slane %v2058_v14, 2  ;;  %v2050_v24 = vrot.slane %v2049_v45, 4  ;;  %v2168_v3 = vrot.slane %v2167_v33, 4  ;;  %v2082_v44 = vsub.f32 %v4608_v35, %v2048_v27 }
 0x291   :  { %v2177_v52 = vrot.slane %v2176_v36, 2  ;;  %v2040_v42 = vrot.slane %v2039_v54, 1  ;;  %v3870_v10 = vpop.eup %3869  ;;  %v2158_v1 = vrot.slane %v2157_v18, 1  ;;  %v2262_v57 = vpack.c.bf16 %v2246_v22, %v2246_v22 }
 0x292   :  { %v2060_v31 = vmax.f32 %v2058_v14, %v2059_v59  ;;  %v2051_v26 = vmax.f32 %v2049_v45, %v2050_v24  ;;  %v4656_v11 = vpop.f32.mrb[36].mxu1  ;;  %v2169_v5 = vadd.f32 %v2168_v3, %v2167_v33  ;;  %v2110_v8 = vmul.f32 1.442695, %v2082_v44 }
 0x293   :  { %v2178_v20 = vadd.f32 %v2177_v52, %v2176_v36  ;;  %v2041_v25 = vmax.f32 %v2039_v54, %v2040_v42  ;;  %v3725_v17 = vpop.f32.mrb[37].mxu1  ;;  %v4658_v29 = vpop.eup %3871  ;;  %v4664_v35 = vrot.slane %v1116_v63, %v4172_v51  ;;  %v2159_v53 = vadd.f32 %v2158_v1, %v2157_v18  ;;  %3730 = vmatmul.mubr.msk.bf16.vlgmr.msra.gmra.mrb[36].mxu0 %vm1957_vm4, %v2262_v57 }
 0x294   :  { %v2061_v61 = vrot.slane %v2060_v31, 1  ;;  %v2052_v14 = vrot.slane %v2051_v26, 2  ;;  %v1954_v22 = vpop.f32.mrb[38].mxu1  ;;  %v2170_v36 = vrot.slane %v2169_v5, 2  ;;  %3879 = vpow2.f32 %v2110_v8  ;;  %3740 = vmatpush3.bf16.msra.mxu0 %v4482_v30  ;;  %3741 = vmatprep.mubr.msk.bf16.mxu0 %vm3978_vm1, %v3977_v0 }
 0x295   :  { %v4667_v45 = vpop.eup %3873  ;;  %v2081_v27 = vsub.f32 %v4623_v4, %v2041_v25  ;;  %v2063_v54 = vsel %vm1957_vm4, %v4656_v11, -inf  ;;  %v3726_v63 = vpop.f32.mrb[39].mxu1  ;;  %v2166_v18 = vadd.f32 %v2165_v21, %v4634_v49  ;;  %3751 = vmatprep.subr.bf16.mxu0 %v3977_v0  ;;  %v2179_v52 = vrot.slane %v2178_v20, 1 }
 0x296   :  { %v2188_v33 = vsel %vm1957_vm4, %v4667_v45, 0.0  ;;  %v2062_v59 = vmax.f32 %v2060_v31, %v2061_v61  ;;  %v2053_v24 = vmax.f32 %v2051_v26, %v2052_v14  ;;  %v2171_v4 = vadd.f32 %v2170_v36, %v2169_v5 }
 0x297   :  { %v2189_v3 = vrot.slane %v2188_v33, 4  ;;  %v2108_v30 = vmul.f32 1.442695, %v2081_v27  ;;  %v3876_v44 = vpop.eup %3875  ;;  %v2064_v57 = vrot.slane %v2063_v54, 4  ;;  %v2247_v8 = vmul.f32 %v3870_v10, %v4582_v41 }
 0x298   :  { %v2084_v42 = vsub.f32 %v4629_v38, %v2062_v59  ;;  %v2054_v1 = vrot.slane %v2053_v24, 1  ;;  %3881 = vrcp.f32 %v2159_v53  ;;  %v2172_v49 = vrot.slane %v2171_v4, 1 }
 0x299   :  { %v4681_v25 = vpop.eup %3877  ;;  %v2190_v21 = vadd.f32 %v2189_v3, %v2188_v33  ;;  %v2248_v31 = vmul.f32 %v3866_v43, %v4553_v37  ;;  %3883 = vpow2.f32 %v2108_v30  ;;  %v2065_v14 = vmax.f32 %v2063_v54, %v2064_v57 }
 0x29a   :  { %v2181_v26 = vsel %vm1957_vm4, %v4681_v25, 0.0  ;;  %v2114_v5 = vmul.f32 1.442695, %v2084_v42  ;;  %v2055_v17 = vmax.f32 %v2053_v24, %v2054_v1  ;;  %3885 = vrcp.f32 %v2166_v18 }
 0x29b   :  { %v2191_v61 = vrot.slane %v2190_v21, 2  ;;  %v2182_v38 = vrot.slane %v2181_v26, 4  ;;  %v2263_v10 = vpack.c.bf16 %v2247_v8, %v2247_v8  ;;  %v2264_v22 = vpack.c.bf16 %v2248_v31, %v2248_v31 }
 0x29c   :  { %3887 = vpow2.f32 %v2114_v5  ;;  %v2083_v41 = vsub.f32 %v4640_v7, %v2055_v17  ;;  %v1132_v53 = vcombine.low %v4556_v34, %v4580_v2  ;;  %v2173_v36 = vadd.f32 %v2172_v49, %v2171_v4 }
 0x29d   :  { %v2183_v37 = vadd.f32 %v2182_v38, %v2181_v26  ;;  %v2066_v43 = vrot.slane %v2065_v14, 2  ;;  %v1164_v27 = vcombine.low %v4621_v39, %v4664_v35  ;;  %v2180_v63 = vadd.f32 %v2179_v52, %v2178_v20  ;;  %3736 = vmatmul.mubr.msk.bf16.vlgmr.msra.gmra.mrb[40].mxu1 %vm1957_vm4, %v2263_v10  ;;  %3742 = vmatmul.mubr.msk.bf16.vlgmr.msra.gmra.mrb[40].mxu0 %vm1957_vm4, %v2264_v22 }
 0x29e   :  { %v2112_v33 = vmul.f32 1.442695, %v2083_v41  ;;  %v2249_v54 = vmul.f32 %v3876_v44, %v4606_v19  ;;  %v4694_v7 = vpop.eup %3879  ;;  %v4700_v18 = vrot.slane %v1085_v56, %v4172_v51  ;;  %v2192_v59 = vadd.f32 %v2191_v61, %v2190_v21  ;;  %3746 = vmatpush3.bf16.msra.mxu1 %v4485_v32  ;;  %3752 = vmatpush3.bf16.msra.mxu0 %v4498_v48 }
 0x29f   :  { %v2184_v24 = vrot.slane %v2183_v37, 2  ;;  %v2067_v4 = vmax.f32 %v2065_v14, %v2066_v43  ;;  %v1133_v20 = vcombine.high %v4556_v34, %v4580_v2  ;;  %v2202_v19 = vsel %vm1957_vm4, %v4694_v7, 0.0  ;;  %3747 = vmatprep.mubr.msk.bf16.mxu1 %vm3978_vm1, %v3977_v0  ;;  %3753 = vmatprep.mubr.msk.bf16.mxu0 %vm3978_vm1, %v3977_v0 }
 0x2a0   :  { %3889 = vpow2.f32 %v2112_v33  ;;  %v2250_v60 = vmul.f32 %v4658_v29, %v4590_v13  ;;  %v2203_v55 = vrot.slane %v2202_v19, 4  ;;  %3757 = vmatprep.subr.bf16.mxu1 %v3977_v0  ;;  %3763 = vmatprep.subr.bf16.mxu0 %v3977_v0  ;;  %v1140_v34 = vrot.slane %v1132_v53, %v4178_v62 }
 0x2a1   :  { %3891 = vrcp.f32 %v2173_v36  ;;  %v2185_v32 = vadd.f32 %v2184_v24, %v2183_v37  ;;  %v2068_v48 = vrot.slane %v2067_v4, 1  ;;  %v1172_v56 = vrot.slane %v1164_v27, %v4178_v62 }
 0x2a2   :  { %3893 = vrcp.f32 %v2180_v63  ;;  %v2265_v2 = vpack.c.bf16 %v2249_v54, %v2249_v54  ;;  %v3882_v52 = vpop.eup %3881  ;;  %v2193_v3 = vrot.slane %v2192_v59, 1  ;;  %v2204_v44 = vadd.f32 %v2203_v55, %v2202_v19 }
 0x2a3   :  { %v2186_v30 = vrot.slane %v2185_v32, 1  ;;  %v2069_v42 = vmax.f32 %v2067_v4, %v2068_v48  ;;  %v4718_v13 = vpop.eup %3883  ;;  %v1101_v29 = vcombine.high %v4545_v23, %v4575_v47  ;;  %v1117_v1 = vcombine.high %v4570_v58, %v4592_v16 }
 0x2a4   :  { %v1165_v57 = vcombine.high %v4621_v39, %v4664_v35  ;;  %v2266_v8 = vpack.c.bf16 %v2250_v60, %v2250_v60  ;;  %v3886_v49 = vpop.eup %3885  ;;  %v2205_v31 = vrot.slane %v2204_v44, 2  ;;  %v2195_v26 = vsel %vm1957_vm4, %v4718_v13, 0.0 }
 0x2a5   :  { %v2187_v21 = vadd.f32 %v2186_v30, %v2185_v32  ;;  %v2085_v5 = vsub.f32 %v4656_v11, %v2069_v42  ;;  %v4732_v61 = vrot.slane %v1133_v20, %v4178_v62  ;;  %v2196_v23 = vrot.slane %v2195_v26, 4  ;;  %3748 = vmatmul.mubr.msk.bf16.vlgmr.msra.gmra.mrb[44].mxu1 %vm1957_vm4, %v2265_v2 }
 0x2a6   :  { %v4729_v17 = vpop.eup %3887  ;;  %3754 = vmatmul.mubr.msk.bf16.vlgmr.msra.gmra.mrb[44].mxu0 %vm1957_vm4, %v2266_v8  ;;  %v2251_v58 = vmul.f32 %v3882_v52, %v4632_v46  ;;  %v1196_v47 = vcombine.low %v1140_v34, %v1172_v56  ;;  %v2194_v16 = vadd.f32 %v2193_v3, %v2192_v59  ;;  %v2206_v39 = vadd.f32 %v2205_v31, %v2204_v44 }
 0x2a7   :  { %v2216_v35 = vsel %vm1957_vm4, %v4729_v17, 0.0  ;;  %v2116_v38 = vmul.f32 1.442695, %v2085_v5  ;;  %3758 = vmatpush3.bf16.msra.mxu1 %v4501_v12  ;;  %3764 = vmatpush3.bf16.msra.mxu0 %v4507_v6  ;;  %3895 = vrcp.f32 %v2187_v21  ;;  %v2197_v11 = vadd.f32 %v2196_v23, %v2195_v26 }
 0x2a8   :  { %v2217_v14 = vrot.slane %v2216_v35, 4  ;;  %3759 = vmatprep.mubr.msk.bf16.mxu1 %vm3978_vm1, %v3977_v0  ;;  %3765 = vmatprep.mubr.msk.bf16.mxu0 %vm3978_vm1, %v3977_v0  ;;  %v2252_v46 = vmul.f32 %v3886_v49, %v4612_v40  ;;  %v4747_v41 = vrot.slane %v1101_v29, %v4172_v51  ;;  %v4750_v10 = vrot.slane %v1117_v1, %v4172_v51 }
 0x2a9   :  { %v1179_v12 = vrot.slane %v1165_v57, %v4178_v62  ;;  %3897 = vpow2.f32 %v2116_v38  ;;  %3769 = vmatprep.subr.bf16.mxu1 %v3977_v0  ;;  %3775 = vmatprep.subr.bf16.mxu0 %v3977_v0  ;;  %v2198_v22 = vrot.slane %v2197_v11, 2  ;;  %v2267_v36 = vpack.c.bf16 %v2251_v58, %v2251_v58 }
 0x2aa   :  { %v4755_v6 = vpop.eup %3889  ;;  %v2218_v53 = vadd.f32 %v2217_v14, %v2216_v35  ;;  %v1212_v37 = vpack.c.bf16 %v1196_v47, %v1196_v47  ;;  %3899 = vrcp.f32 %v2194_v16  ;;  %v2207_v43 = vrot.slane %v2206_v39, 1 }
 0x2ab   :  { %v3892_v40 = vpop.eup %3891  ;;  %v2209_v27 = vsel %vm1957_vm4, %v4755_v6, 0.0  ;;  %v2199_v33 = vadd.f32 %v2198_v22, %v2197_v11  ;;  %v2268_v24 = vpack.c.bf16 %v2252_v46, %v2252_v46  ;;  %v1148_v4 = vcombine.low %v4566_v50, %v4700_v18 }
 0x2ac   :  { %v3894_v63 = vpop.eup %3893  ;;  %v2219_v54 = vrot.slane %v2218_v53, 2  ;;  %v2210_v59 = vrot.slane %v2209_v27, 4  ;;  %v1180_v20 = vcombine.low %v4747_v41, %v4750_v10  ;;  %v1197_v19 = vcombine.high %v1140_v34, %v1172_v56 }
 0x2ad   :  { %v1198_v60 = vcombine.low %v4732_v61, %v1179_v12  ;;  %v2200_v32 = vrot.slane %v2199_v33, 1  ;;  %3760 = vmatmul.mubr.msk.bf16.vlgmr.msra.gmra.mrb[48].mxu1 %vm1957_vm4, %v2267_v36  ;;  %v2651_v48 = vsel %vm2281_vm3, %v1212_v37, 0  ;;  %v2253_v2 = vmul.f32 %v3892_v40, %v4651_v15 }
 0x2ae   :  { %v2211_v55 = vadd.f32 %v2210_v59, %v2209_v27  ;;  %3766 = vmatmul.mubr.msk.bf16.vlgmr.msra.gmra.mrb[48].mxu0 %vm1957_vm4, %v2268_v24  ;;  %v2208_v52 = vadd.f32 %v2207_v43, %v2206_v39  ;;  %v2220_v3 = vadd.f32 %v2219_v54, %v2218_v53  ;;  %3770 = vmatpush3.bf16.msra.mxu1 %v4511_v28 }
 0x2af   :  { %3776 = vmatpush3.bf16.msra.mxu0 %v2651_v48  ;;  %v2201_v30 = vadd.f32 %v2200_v32, %v2199_v33  ;;  %3771 = vmatprep.mubr.msk.bf16.mxu1 %vm3978_vm1, %v3977_v0  ;;  %v2254_v34 = vmul.f32 %v3894_v63, %v4642_v9  ;;  %v1156_v56 = vrot.slane %v1148_v4, %v4178_v62 }
 0x2b0   :  { %v2212_v44 = vrot.slane %v2211_v55, 2  ;;  %3777 = vmatprep.mubr.msk.bf16.mxu0 %vm3978_vm1, %v3977_v0  ;;  %v1188_v42 = vrot.slane %v1180_v20, %v4178_v62  ;;  %3781 = vmatprep.subr.bf16.mxu1 %v3977_v0  ;;  %v1213_v28 = vpack.c.bf16 %v1197_v19, %v1197_v19  ;;  %v2269_v1 = vpack.c.bf16 %v2253_v2, %v2253_v2 }
 0x2b1   :  { %3787 = vmatprep.subr.bf16.mxu0 %v3977_v0  ;;  %v3896_v15 = vpop.eup %3895  ;;  %3901 = vrcp.f32 %v2201_v30  ;;  %v1214_v57 = vpack.c.bf16 %v1198_v60, %v1198_v60  ;;  %v2221_v49 = vrot.slane %v2220_v3, 1  ;;  %v1149_v9 = vcombine.high %v4566_v50, %v4700_v18 }
 0x2b2   :  { %v2213_v29 = vadd.f32 %v2212_v44, %v2211_v55  ;;  %3903 = vrcp.f32 %v2208_v52  ;;  %v2270_v26 = vpack.c.bf16 %v2254_v34, %v2254_v34  ;;  %v1181_v23 = vcombine.high %v4747_v41, %v4750_v10 }
 0x2b3   :  { %v4778_v8 = vpop.eup %3897  ;;  %v1199_v47 = vcombine.high %v4732_v61, %v1179_v12  ;;  %v1200_v16 = vcombine.low %v1156_v56, %v1188_v42  ;;  %v2697_v50 = vsel %vm2281_vm3, %v1213_v28, 0  ;;  %v2743_v18 = vsel %vm2281_vm3, %v1214_v57, 0 }
 0x2b4   :  { %v2214_v21 = vrot.slane %v2213_v29, 1  ;;  %v2223_v31 = vsel %vm1957_vm4, %v4778_v8, 0.0  ;;  %v3900_v5 = vpop.eup %3899  ;;  %v2255_v35 = vmul.f32 %v3896_v15, %v4681_v25  ;;  %v2222_v38 = vadd.f32 %v2221_v49, %v2220_v3 }
 0x2b5   :  { %v2224_v58 = vrot.slane %v2223_v31, 4  ;;  %3772 = vmatmul.mubr.msk.bf16.vlgmr.msra.gmra.mrb[52].mxu1 %vm1957_vm4, %v2269_v1  ;;  %v2256_v61 = vmul.f32 %v3900_v5, %v4667_v45  ;;  %v1163_v14 = vrot.slane %v1149_v9, %v4178_v62  ;;  %v1195_v25 = vrot.slane %v1181_v23, %v4178_v62 }
 0x2b6   :  { %v2215_v39 = vadd.f32 %v2214_v21, %v2213_v29  ;;  %3778 = vmatmul.mubr.msk.bf16.vlgmr.msra.gmra.mrb[52].mxu0 %vm1957_vm4, %v2270_v26  ;;  %3782 = vmatpush3.bf16.msra.mxu1 %v2697_v50  ;;  %v2271_v41 = vpack.c.bf16 %v2255_v35, %v2255_v35  ;;  %v1215_v10 = vpack.c.bf16 %v1199_v47, %v1199_v47 }
 0x2b7   :  { %v2225_v11 = vadd.f32 %v2224_v58, %v2223_v31  ;;  %3788 = vmatpush3.bf16.msra.mxu0 %v2743_v18  ;;  %3783 = vmatprep.mubr.msk.bf16.mxu1 %vm3978_vm1, %v3977_v0  ;;  %v1216_v12 = vpack.c.bf16 %v1200_v16, %v1200_v16  ;;  %v2272_v36 = vpack.c.bf16 %v2256_v61, %v2256_v61 }
 0x2b8   :  { %3789 = vmatprep.mubr.msk.bf16.mxu0 %vm3978_vm1, %v3977_v0  ;;  %3905 = vrcp.f32 %v2215_v39  ;;  %3793 = vmatprep.subr.bf16.mxu1 %v3977_v0  ;;  %v1201_v45 = vcombine.high %v1156_v56, %v1188_v42  ;;  %v2789_v43 = vsel %vm2281_vm3, %v1215_v10, 0  ;;  %v1202_v33 = vcombine.low %v1163_v14, %v1195_v25 }
 0x2b9   :  { %v2226_v46 = vrot.slane %v2225_v11, 2  ;;  %3799 = vmatprep.subr.bf16.mxu0 %v3977_v0  ;;  %3907 = vrcp.f32 %v2222_v38  ;;  %v2835_v27 = vsel %vm2281_vm3, %v1216_v12, 0  ;;  %v1203_v48 = vcombine.high %v1163_v14, %v1195_v25 }
 0x2ba   :  { %v1217_v4 = vpack.c.bf16 %v1201_v45, %v1201_v45 }
 0x2bb   :  { %v2227_v22 = vadd.f32 %v2226_v46, %v2225_v11  ;;  %v3902_v53 = vpop.eup %3901  ;;  %v1219_v3 = vpack.c.bf16 %v1203_v48, %v1203_v48 }
 0x2bc   :  { %v3904_v37 = vpop.eup %3903  ;;  %v2257_v63 = vmul.f32 %v3902_v53, %v4718_v13  ;;  %v1218_v13 = vpack.c.bf16 %v1202_v33, %v1202_v33  ;;  %v2881_v32 = vsel %vm2281_vm3, %v1217_v4, 0 }
 0x2bd   :  { %v2228_v40 = vrot.slane %v2227_v22, 1  ;;  %3784 = vmatmul.mubr.msk.bf16.vlgmr.msra.gmra.mrb[56].mxu1 %vm1957_vm4, %v2271_v41  ;;  %v2258_v59 = vmul.f32 %v3904_v37, %v4694_v7 }
 0x2be   :  { %3790 = vmatmul.mubr.msk.bf16.vlgmr.msra.gmra.mrb[56].mxu0 %vm1957_vm4, %v2272_v36  ;;  %3794 = vmatpush3.bf16.msra.mxu1 %v2789_v43  ;;  %v2273_v24 = vpack.c.bf16 %v2257_v63, %v2257_v63  ;;  %v2927_v55 = vsel %vm2281_vm3, %v1218_v13, 0 }
 0x2bf   :  { %v2229_v54 = vadd.f32 %v2228_v40, %v2227_v22  ;;  %3800 = vmatpush3.bf16.msra.mxu0 %v2835_v27  ;;  %3795 = vmatprep.mubr.msk.bf16.mxu1 %vm3978_vm1, %v3977_v0  ;;  %v2274_v19 = vpack.c.bf16 %v2258_v59, %v2258_v59 }
 0x2c0   :  { %3801 = vmatprep.mubr.msk.bf16.mxu0 %vm3978_vm1, %v3977_v0  ;;  %3805 = vmatprep.subr.bf16.mxu1 %v3977_v0 }
 0x2c1   :  { %3909 = vrcp.f32 %v2229_v54  ;;  %3811 = vmatprep.subr.bf16.mxu0 %v3977_v0 }
 0x2c2   :  { %v3906_v20 = vpop.eup %3905 }
 0x2c3   :  { %v3908_v60 = vpop.eup %3907  ;;  %v2259_v7 = vmul.f32 %v3906_v20, %v4755_v6  ;;  %v2973_v6 = vsel %vm2281_vm3, %v1219_v3, 0 }
 0x2c4   :  { %v2260_v2 = vmul.f32 %v3908_v60, %v4729_v17 }
 0x2c5   :  { %3796 = vmatmul.mubr.msk.bf16.vlgmr.msra.gmra.mrb[60].mxu1 %vm1957_vm4, %v2273_v24  ;;  %v2275_v52 = vpack.c.bf16 %v2259_v7, %v2259_v7 }
 0x2c6   :  { %3802 = vmatmul.mubr.msk.bf16.vlgmr.msra.gmra.mrb[60].mxu0 %vm1957_vm4, %v2274_v19  ;;  %3806 = vmatpush3.bf16.msra.mxu1 %v2881_v32  ;;  %v2276_v44 = vpack.c.bf16 %v2260_v2, %v2260_v2 }
 0x2c7   :  { %3812 = vmatpush3.bf16.msra.mxu0 %v2927_v55  ;;  %3807 = vmatprep.mubr.msk.bf16.mxu1 %vm3978_vm1, %v3977_v0 }
 0x2c8   :  { %3813 = vmatprep.mubr.msk.bf16.mxu0 %vm3978_vm1, %v3977_v0  ;;  %3817 = vmatprep.subr.bf16.mxu1 %v3977_v0 }
 0x2cb   :  { %v3910_v30 = vpop.eup %3909 }
 0x2cc   :  { %v2261_v34 = vmul.f32 %v3910_v30, %v4778_v8 }
 0x2cd   :  { %3808 = vmatmul.mubr.msk.bf16.vlgmr.msra.gmra.mrb[64].mxu1 %vm1957_vm4, %v2275_v52 }
 0x2ce   :  { %3814 = vmatmul.mubr.msk.bf16.vlgmr.msra.gmra.mrb[64].mxu0 %vm1957_vm4, %v2276_v44  ;;  %3818 = vmatpush3.bf16.msra.mxu1 %v2973_v6  ;;  %v2277_v56 = vpack.c.bf16 %v2261_v34, %v2261_v34 }
 0x2cf   :  { %3819 = vmatprep.mubr.msk.bf16.mxu1 %vm3978_vm1, %v3977_v0 }
 0x2d5   :  { %3820 = vmatmul.mubr.msk.bf16.vlgmr.msra.gmra.mrb[68].mxu1 %vm1957_vm4, %v2277_v56 }
 0x366   :  { %v2319_v17 = vpop.f32.mrb[36].mxu0 }
 0x367   :  { %v3731_v42 = vpop.f32.mrb[37].mxu0  ;;  %v3518_v29 = vmul.f32 -1.442695, %v2319_v17 }
 0x368   :  { %v2322_v28 = vpop.f32.mrb[38].mxu0 }
 0x369   :  { %v3732_v15 = vpop.f32.mrb[39].mxu0  ;;  %3911 = vpow2.f32 %v3518_v29 }
 0x370   :  { %v2365_v1 = vpop.f32.mrb[40].mxu1  ;;  %v2411_v57 = vpop.f32.mrb[40].mxu0 }
 0x371   :  { %v3520_v49 = vmul.f32 -1.442695, %v2411_v57  ;;  %v3737_v9 = vpop.f32.mrb[41].mxu1  ;;  %v3743_v21 = vpop.f32.mrb[41].mxu0  ;;  %v3519_v31 = vmul.f32 -1.442695, %v2365_v1 }
 0x372   :  { %v2368_v8 = vpop.f32.mrb[42].mxu1  ;;  %v2414_v26 = vpop.f32.mrb[42].mxu0 }
 0x373   :  { %v3738_v5 = vpop.f32.mrb[43].mxu1  ;;  %v3744_v23 = vpop.f32.mrb[43].mxu0  ;;  %3913 = vpow2.f32 %v3520_v49 }
 0x374   :  { %3915 = vpow2.f32 %v3519_v31  ;;  %v3912_v47 = vpop.eup %3911 }
 0x375   :  { %v3063_v14 = vadd.f32 1.0, %v3912_v47 }
 0x378   :  { %v2457_v0 = vpop.f32.mrb[44].mxu1 }
 0x379   :  { %v2503_v58 = vpop.f32.mrb[44].mxu0  ;;  %v3521_v16 = vmul.f32 -1.442695, %v2457_v0  ;;  %v3749_v39 = vpop.f32.mrb[45].mxu1 }
 0x37a   :  { %v3755_v50 = vpop.f32.mrb[45].mxu0  ;;  %v3522_v18 = vmul.f32 -1.442695, %v2503_v58  ;;  %v2460_v35 = vpop.f32.mrb[46].mxu1 }
 0x37b   :  { %v2506_v38 = vpop.f32.mrb[46].mxu0  ;;  %3917 = vpow2.f32 %v3521_v16  ;;  %v3750_v11 = vpop.f32.mrb[47].mxu1 }
 0x37c   :  { %v3756_v61 = vpop.f32.mrb[47].mxu0  ;;  %3919 = vpow2.f32 %v3522_v18 }
 0x37d   :  { %v3914_v46 = vpop.eup %3913  ;;  %3921 = vrcp.f32 %v3063_v14 }
 0x37e   :  { %v3065_v25 = vadd.f32 1.0, %v3914_v46  ;;  %v3916_v41 = vpop.eup %3915 }
 0x37f   :  { %v3064_v43 = vadd.f32 1.0, %v3916_v41 }
 0x380   :  { %v2549_v10 = vpop.f32.mrb[48].mxu1  ;;  %3923 = vrcp.f32 %v3065_v25 }
 0x381   :  { %v2595_v12 = vpop.f32.mrb[48].mxu0  ;;  %v3761_v53 = vpop.f32.mrb[49].mxu1  ;;  %v3523_v37 = vmul.f32 -1.442695, %v2549_v10 }
 0x382   :  { %v3524_v22 = vmul.f32 -1.442695, %v2595_v12  ;;  %v3767_v36 = vpop.f32.mrb[49].mxu0  ;;  %v2552_v40 = vpop.f32.mrb[50].mxu1 }
 0x383   :  { %v2598_v45 = vpop.f32.mrb[50].mxu0  ;;  %v3762_v27 = vpop.f32.mrb[51].mxu1 }
 0x384   :  { %v3768_v63 = vpop.f32.mrb[51].mxu0  ;;  %3925 = vpow2.f32 %v3524_v22 }
 0x385   :  { %v3918_v33 = vpop.eup %3917  ;;  %3927 = vpow2.f32 %v3523_v37 }
 0x386   :  { %v3066_v54 = vadd.f32 1.0, %v3918_v33  ;;  %3929 = vrcp.f32 %v3064_v43  ;;  %v3920_v59 = vpop.eup %3919 }
 0x387   :  { %v3922_v60 = vpop.eup %3921  ;;  %v3067_v48 = vadd.f32 1.0, %v3920_v59 }
 0x388   :  { %3931 = vrcp.f32 %v3066_v54  ;;  %v2641_v24 = vpop.f32.mrb[52].mxu1 }
 0x389   :  { %v2687_v4 = vpop.f32.mrb[52].mxu0  ;;  %v3525_v13 = vmul.f32 -1.442695, %v2641_v24  ;;  %v3773_v20 = vpop.f32.mrb[53].mxu1 }
 0x38a   :  { %v3779_v19 = vpop.f32.mrb[53].mxu0  ;;  %v2644_v32 = vpop.f32.mrb[54].mxu1  ;;  %v3526_v3 = vmul.f32 -1.442695, %v2687_v4 }
 0x38b   :  { %v2690_v55 = vpop.f32.mrb[54].mxu0  ;;  %v3924_v7 = vpop.eup %3923  ;;  %3933 = vpow2.f32 %v3525_v13 }
 0x38c   :  { %v3774_v2 = vpop.f32.mrb[55].mxu1  ;;  %v3780_v52 = vpop.f32.mrb[55].mxu0  ;;  %v3111_v30 = vcombine.low %v3922_v60, %v3924_v7  ;;  %v3112_v44 = vcombine.high %v3922_v60, %v3924_v7  ;;  %3935 = vrcp.f32 %v3067_v48 }
 0x38d   :  { %3937 = vpow2.f32 %v3526_v3 }
 0x38e   :  { %v3926_v6 = vpop.eup %3925  ;;  %v4832_v58 = vrot.slane %v3111_v30, %v4172_v51  ;;  %v4838_v16 = vrot.slane %v3112_v44, %v4172_v51 }
 0x38f   :  { %v3069_v34 = vadd.f32 1.0, %v3926_v6  ;;  %v3928_v56 = vpop.eup %3927 }
 0x390   :  { %v2733_v17 = vpop.f32.mrb[56].mxu1  ;;  %v3930_v28 = vpop.eup %3929  ;;  %v3068_v31 = vadd.f32 1.0, %v3928_v56 }
 0x391   :  { %v2779_v42 = vpop.f32.mrb[56].mxu0  ;;  %3939 = vrcp.f32 %v3069_v34  ;;  %v3785_v29 = vpop.f32.mrb[57].mxu1  ;;  %v3527_v49 = vmul.f32 -1.442695, %v2733_v17 }
 0x392   :  { %v3528_v15 = vmul.f32 -1.442695, %v2779_v42  ;;  %v3791_v1 = vpop.f32.mrb[57].mxu0  ;;  %v3932_v57 = vpop.eup %3931 }
 0x393   :  { %v2736_v9 = vpop.f32.mrb[58].mxu1  ;;  %v2782_v21 = vpop.f32.mrb[58].mxu0  ;;  %v3127_v5 = vcombine.low %v3930_v28, %v3932_v57  ;;  %v3128_v23 = vcombine.high %v3930_v28, %v3932_v57 }
 0x394   :  { %v3786_v8 = vpop.f32.mrb[59].mxu1  ;;  %v3792_v26 = vpop.f32.mrb[59].mxu0  ;;  %3941 = vpow2.f32 %v3528_v15 }
 0x395   :  { %v3934_v0 = vpop.eup %3933  ;;  %v4835_v47 = vrot.slane %v3127_v5, %v4172_v51  ;;  %v4841_v39 = vrot.slane %v3128_v23, %v4172_v51  ;;  %3943 = vpow2.f32 %v3527_v49 }
 0x396   :  { %v3070_v50 = vadd.f32 1.0, %v3934_v0  ;;  %3945 = vrcp.f32 %v3068_v31  ;;  %v3936_v46 = vpop.eup %3935 }
 0x397   :  { %v3175_v18 = vcombine.low %v4832_v58, %v4835_v47  ;;  %v3176_v35 = vcombine.high %v4832_v58, %v4835_v47  ;;  %v3191_v38 = vcombine.low %v4838_v16, %v4841_v39  ;;  %v3192_v14 = vcombine.high %v4838_v16, %v4841_v39  ;;  %v3938_v22 = vpop.eup %3937 }
 0x398   :  { %3947 = vrcp.f32 %v3070_v50  ;;  %v2825_v11 = vpop.f32.mrb[60].mxu1  ;;  %v3071_v33 = vadd.f32 1.0, %v3938_v22 }
 0x399   :  { %v2871_v61 = vpop.f32.mrb[60].mxu0  ;;  %v3529_v25 = vmul.f32 -1.442695, %v2825_v11  ;;  %v3797_v10 = vpop.f32.mrb[61].mxu1  ;;  %v4856_v9 = vrot.slane %v3175_v18, %v4178_v62  ;;  %v3190_v21 = vrot.slane %v3176_v35, %v4178_v62  ;;  %v3199_v0 = vrot.slane %v3191_v38, %v4178_v62 }
 0x39a   :  { %v3530_v41 = vmul.f32 -1.442695, %v2871_v61  ;;  %v3803_v12 = vpop.f32.mrb[61].mxu0  ;;  %v2828_v53 = vpop.f32.mrb[62].mxu1  ;;  %v3206_v18 = vrot.slane %v3192_v14, %v4178_v62 }
 0x39b   :  { %v2874_v36 = vpop.f32.mrb[62].mxu0  ;;  %v3940_v37 = vpop.eup %3939  ;;  %3949 = vpow2.f32 %v3529_v25 }
 0x39c   :  { %v3798_v40 = vpop.f32.mrb[63].mxu1  ;;  %v3804_v45 = vpop.f32.mrb[63].mxu0  ;;  %v3143_v43 = vcombine.low %v3936_v46, %v3940_v37  ;;  %v3144_v27 = vcombine.high %v3936_v46, %v3940_v37  ;;  %3951 = vpow2.f32 %v3530_v41 }
 0x39e   :  { %v3942_v63 = vpop.eup %3941  ;;  %v3151_v6 = vrot.slane %v3143_v43, %v4172_v51  ;;  %v3158_v17 = vrot.slane %v3144_v27, %v4172_v51 }
 0x39f   :  { %v3073_v54 = vadd.f32 1.0, %v3942_v63  ;;  %v3944_v59 = vpop.eup %3943 }
 0x3a0   :  { %v2917_v24 = vpop.f32.mrb[64].mxu1  ;;  %v3946_v13 = vpop.eup %3945  ;;  %v3072_v2 = vadd.f32 1.0, %v3944_v59 }
 0x3a1   :  { %v2963_v4 = vpop.f32.mrb[64].mxu0  ;;  %3953 = vrcp.f32 %v3073_v54  ;;  %v3531_v20 = vmul.f32 -1.442695, %v2917_v24  ;;  %v3809_v60 = vpop.f32.mrb[65].mxu1 }
 0x3a2   :  { %v3532_v19 = vmul.f32 -1.442695, %v2963_v4  ;;  %v3815_v32 = vpop.f32.mrb[65].mxu0  ;;  %v3948_v55 = vpop.eup %3947  ;;  %3955 = vrcp.f32 %v3071_v33 }
 0x3a3   :  { %v2920_v7 = vpop.f32.mrb[66].mxu1  ;;  %v2966_v48 = vpop.f32.mrb[66].mxu0  ;;  %v3159_v30 = vcombine.low %v3946_v13, %v3948_v55  ;;  %v3160_v44 = vcombine.high %v3946_v13, %v3948_v55 }
 0x3a4   :  { %v3810_v52 = vpop.f32.mrb[67].mxu1  ;;  %v3816_v3 = vpop.f32.mrb[67].mxu0  ;;  %3957 = vpow2.f32 %v3532_v19 }
 0x3a5   :  { %v3950_v34 = vpop.eup %3949  ;;  %3959 = vpow2.f32 %v3531_v20  ;;  %v3167_v56 = vrot.slane %v3159_v30, %v4172_v51  ;;  %v3174_v42 = vrot.slane %v3160_v44, %v4172_v51 }
 0x3a6   :  { %v3074_v28 = vadd.f32 1.0, %v3950_v34  ;;  %v3952_v15 = vpop.eup %3951  ;;  %3961 = vrcp.f32 %v3072_v2 }
 0x3a7   :  { %v3207_v29 = vcombine.low %v3151_v6, %v3167_v56  ;;  %v3208_v1 = vcombine.high %v3151_v6, %v3167_v56  ;;  %v3223_v57 = vcombine.low %v3158_v17, %v3174_v42  ;;  %v3224_v31 = vcombine.high %v3158_v17, %v3174_v42 }
 0x3a8   :  { %3963 = vrcp.f32 %v3074_v28  ;;  %v3009_v49 = vpop.f32.mrb[68].mxu1  ;;  %v3075_v58 = vadd.f32 1.0, %v3952_v15 }
 0x3a9   :  { %v3533_v8 = vmul.f32 -1.442695, %v3009_v49  ;;  %v3821_v26 = vpop.f32.mrb[69].mxu1  ;;  %v4860_v5 = vrot.slane %v3207_v29, %v4178_v62  ;;  %v3222_v23 = vrot.slane %v3208_v1, %v4178_v62  ;;  %v3231_v50 = vrot.slane %v3223_v57, %v4178_v62 }
 0x3aa   :  { %v3012_v47 = vpop.f32.mrb[70].mxu1  ;;  %v3238_v35 = vrot.slane %v3224_v31, %v4178_v62 }
 0x3ab   :  { %v3954_v11 = vpop.eup %3953  ;;  %3965 = vpow2.f32 %v3533_v8  ;;  %v3822_v61 = vpop.f32.mrb[71].mxu1  ;;  %v3240_v46 = vcombine.high %v4856_v9, %v4860_v5  ;;  %v3241_v25 = vcombine.low %v3190_v21, %v3222_v23  ;;  %v3242_v41 = vcombine.high %v3190_v21, %v3222_v23 }
 0x3ac   :  { %v3956_v38 = vpop.eup %3955  ;;  %v3243_v10 = vcombine.low %v3199_v0, %v3231_v50  ;;  %v3244_v12 = vcombine.high %v3199_v0, %v3231_v50  ;;  %v3245_v22 = vcombine.low %v3206_v18, %v3238_v35  ;;  %v3246_v53 = vcombine.high %v3206_v18, %v3238_v35 }
 0x3ad   :  { %3385 = vrot.lane.b32.xlu0 %v3240_v46, %s3988_s2  ;;  %v3247_v16 = vcombine.low %v3956_v38, %v3954_v11  ;;  %v3248_v39 = vcombine.high %v3956_v38, %v3954_v11  ;;  %v3239_v14 = vcombine.low %v4856_v9, %v4860_v5  ;;  %3967 = vrcp.f32 %v3075_v58  ;;  %v3975_v5 = vld [vmem:[%s4939_s0] sm:$0xff] }
 0x3ae   :  { %v3958_v36 = vpop.eup %3957 }
 0x3af   :  { %v3960_v37 = vpop.eup %3959  ;;  %v3077_v40 = vadd.f32 1.0, %v3958_v36  ;;  %v3255_v59 = vrot.slane %v3247_v16, %v4172_v51  ;;  %v3262_v4 = vrot.slane %v3248_v39, %v4172_v51 }
 0x3b0   :  { %v3962_v45 = vpop.eup %3961  ;;  %v3076_v27 = vadd.f32 1.0, %v3960_v37 }
 0x3b1   :  { %3969 = vrcp.f32 %v3077_v40  ;;  %3393 = vrot.lane.b32.xlu0 %v3241_v25, %s3989_s13 }
 0x3b2   :  { %v3964_v43 = vpop.eup %3963  ;;  %3971 = vrcp.f32 %v3076_v27 }
 0x3b3   :  { %v3263_v63 = vcombine.low %v3962_v45, %v3964_v43  ;;  %v3264_v33 = vcombine.high %v3962_v45, %v3964_v43 }
 0x3b5   :  { %v3966_v54 = vpop.eup %3965  ;;  %3401 = vrot.lane.b32.xlu0 %v3242_v41, %s3990_s14  ;;  %v3271_v24 = vrot.slane %v3263_v63, %v4172_v51  ;;  %v3278_v13 = vrot.slane %v3264_v33, %v4172_v51 }
 0x3b6   :  { %v3078_v20 = vadd.f32 1.0, %v3966_v54 }
 0x3b7   :  { %v3311_v19 = vcombine.low %v3255_v59, %v3271_v24  ;;  %v3312_v60 = vcombine.high %v3255_v59, %v3271_v24  ;;  %v3327_v32 = vcombine.low %v3262_v4, %v3278_v13  ;;  %v3328_v55 = vcombine.high %v3262_v4, %v3278_v13  ;;  %v3968_v7 = vpop.eup %3967 }
 0x3b8   :  { %3973 = vrcp.f32 %v3078_v20 }
 0x3b9   :  { %3409 = vrot.lane.b32.xlu0 %v3243_v10, %s3991_s15  ;;  %v3319_v57 = vrot.slane %v3311_v19, %v4178_v62  ;;  %v3326_v49 = vrot.slane %v3312_v60, %v4178_v62  ;;  %v3335_v21 = vrot.slane %v3327_v32, %v4178_v62  ;;  %v3976_v32 = vld [vmem:[%s4939_s0 + $0x8] sm:$0xff] }
 0x3bb   :  { %v3970_v48 = vpop.eup %3969 }
 0x3bc   :  { %v3279_v2 = vcombine.low %v3968_v7, %v3970_v48  ;;  %v3280_v52 = vcombine.high %v3968_v7, %v3970_v48  ;;  %v3972_v3 = vpop.eup %3971 }
 0x3bd   :  { %3417 = vrot.lane.b32.xlu0 %v3244_v12, %s3992_s16 }
 0x3be   :  { %v3287_v34 = vrot.slane %v3279_v2, %v4172_v51  ;;  %v3294_v17 = vrot.slane %v3280_v52, %v4172_v51 }
 0x3c1   :  { %3425 = vrot.lane.b32.xlu0 %v3245_v22, %s3993_s17 }
 0x3c2   :  { %v3974_v30 = vpop.eup %3973 }
 0x3c3   :  { %v3295_v44 = vcombine.low %v3972_v3, %v3974_v30  ;;  %v3296_v6 = vcombine.high %v3972_v3, %v3974_v30 }
 0x3c5   :  { %3433 = vrot.lane.b32.xlu0 %v3246_v53, %s3994_s18  ;;  %v3303_v56 = vrot.slane %v3295_v44, %v4172_v51  ;;  %v3310_v42 = vrot.slane %v3296_v6, %v4172_v51  ;;  %v3342_v51 = vrot.slane %v3328_v55, %v4178_v62 }
 0x3c7   :  { %v3343_v28 = vcombine.low %v3287_v34, %v3303_v56  ;;  %v3344_v15 = vcombine.high %v3287_v34, %v3303_v56  ;;  %v3359_v29 = vcombine.low %v3294_v17, %v3310_v42  ;;  %v3360_v1 = vcombine.high %v3294_v17, %v3310_v42 }
 0x3c9   :  { %v3351_v31 = vrot.slane %v3343_v28, %v4178_v62  ;;  %v3358_v8 = vrot.slane %v3344_v15, %v4178_v62  ;;  %v3367_v26 = vrot.slane %v3359_v29, %v4178_v62  ;;  %v3374_v23 = vrot.slane %v3360_v1, %v4178_v62 }
 0x3cb   :  { %v3376_v0 = vcombine.high %v3319_v57, %v3351_v31  ;;  %v3377_v58 = vcombine.low %v3326_v49, %v3358_v8  ;;  %v3378_v47 = vcombine.high %v3326_v49, %v3358_v8  ;;  %v3379_v50 = vcombine.low %v3335_v21, %v3367_v26 }
 0x3cc   :  { %v3380_v18 = vcombine.high %v3335_v21, %v3367_v26  ;;  %v3381_v35 = vcombine.low %v3342_v51, %v3374_v23  ;;  %v3382_v11 = vcombine.high %v3342_v51, %v3374_v23  ;;  %v3375_v61 = vcombine.low %v3319_v57, %v3351_v31 }
 0x3cd   :  { %3387 = vrot.lane.b32.xlu1 %v3376_v0, %s3988_s2 }
 0x3d1   :  { %3395 = vrot.lane.b32.xlu1 %v3377_v58, %s3989_s13 }
 0x3d5   :  { %3403 = vrot.lane.b32.xlu1 %v3378_v47, %s3990_s14 }
 0x3d9   :  { %3411 = vrot.lane.b32.xlu1 %v3379_v50, %s3991_s15 }
 0x3dd   :  { %3419 = vrot.lane.b32.xlu1 %v3380_v18, %s3992_s16 }
 0x3e1   :  { %3427 = vrot.lane.b32.xlu1 %v3381_v35, %s3993_s17 }
 0x3e5   :  { %3435 = vrot.lane.b32.xlu1 %v3382_v11, %s3994_s18 }
 0x41f   :  { %v3386_v62 = vpop.permute.xlu0 %3385 }
 0x420   :  { %v3439_v10 = vsel %vm1220_vm2, %v3239_v14, %v3386_v62 }
 0x423   :  { %v3394_v46 = vpop.permute.xlu0 %3393 }
 0x424   :  { %v3441_v12 = vsel %vm1957_vm4, %v3439_v10, %v3394_v46 }
 0x427   :  { %v3402_v25 = vpop.permute.xlu0 %3401 }
 0x428   :  { %v3444_v53 = vsel %vm3443_vm5, %v3441_v12, %v3402_v25 }
 0x42b   :  { %v3410_v41 = vpop.permute.xlu0 %3409 }
 0x42c   :  { %v3447_v16 = vsel %vm3446_vm6, %v3444_v53, %v3410_v41 }
 0x42f   :  { %v3418_v38 = vpop.permute.xlu0 %3417 }
 0x430   :  { %v3450_v39 = vsel %vm3449_vm7, %v3447_v16, %v3418_v38 }
 0x433   :  { %v3426_v22 = vpop.permute.xlu0 %3425 }
 0x434   :  { %v3453_v36 = vsel %vm3452_vm8, %v3450_v39, %v3426_v22 }
 0x437   :  { %v3434_v37 = vpop.permute.xlu0 %3433 }
 0x438   :  { %v3456_v9 = vsel %vm3455_vm9, %v3453_v36, %v3434_v37 }
 0x439   :  { %v3458_v14 = vadd.f32 %v3975_v5, %v3456_v9 }
 0x43b   :  { %3460 = vst.msk [vmem:[%s4941_s3] sm:$0xff] %vm37_vm0, %v3458_v14 }
 0x43f   :  { %v3388_v40 = vpop.permute.xlu1 %3387 }
 0x440   :  { %v3440_v33 = vsel %vm1220_vm2, %v3375_v61, %v3388_v40 }
 0x443   :  { %v3396_v45 = vpop.permute.xlu1 %3395 }
 0x444   :  { %v3442_v54 = vsel %vm1957_vm4, %v3440_v33, %v3396_v45 }
 0x447   :  { %v3404_v43 = vpop.permute.xlu1 %3403 }
 0x448   :  { %v3445_v24 = vsel %vm3443_vm5, %v3442_v54, %v3404_v43 }
 0x44b   :  { %v3412_v27 = vpop.permute.xlu1 %3411 }
 0x44c   :  { %v3448_v4 = vsel %vm3446_vm6, %v3445_v24, %v3412_v27 }
 0x44f   :  { %v3420_v63 = vpop.permute.xlu1 %3419 }
 0x450   :  { %v3451_v13 = vsel %vm3449_vm7, %v3448_v4, %v3420_v63 }
 0x453   :  { %v3428_v59 = vpop.permute.xlu1 %3427 }
 0x454   :  { %v3454_v20 = vsel %vm3452_vm8, %v3451_v13, %v3428_v59 }
 0x457   :  { %v3436_v19 = vpop.permute.xlu1 %3435 }
 0x458   :  { %v3457_v60 = vsel %vm3455_vm9, %v3454_v20, %v3436_v19 }
 0x459   :  { %v3459_v55 = vadd.f32 %v3976_v32, %v3457_v60 }
 0x45b   :  { %3461 = vst.msk [vmem:[%s4941_s3 + $0x8] sm:$0xff] %vm37_vm0, %v3459_v55 }

</bundles_post_ra>
